<compile_context>
chip_gen: v7x
topology: tpu7x:2x2x1
jax: 0.10.0
libtpu: 0.0.40
codegen_flags: <defaults>
</compile_context>

<pallas_src>
from functools import partial

import numpy as np
import jax
import jax.numpy as jnp
from jax.experimental import pallas as pl
from jax.experimental.pallas import tpu as pltpu


# ---------------------------------------------------------------------------
# Fused Bottleneck kernel: one grid step == one batch element.
# Layout inside the kernel: channels on sublanes, flattened D*H*W on lanes.
# ---------------------------------------------------------------------------
def _bottleneck_kernel(x_ref, w1_ref, b1_ref, w2_ref, b2_ref, w3_ref, b3_ref,
                       mask_ref, o_ref, stack_ref, *, D, H, W, planes, cexp):
    del D, cexp
    HW = H * W
    DHW = stack_ref.shape[1]
    x = x_ref[0]                                   # (cin, DHW), lane-dense

    # ---- conv1 (1x1x1) + BN1 + ReLU -> (planes, DHW) -----------------------
    h1 = jnp.dot(w1_ref[...], x, preferred_element_type=jnp.float32)
    h1 = jnp.maximum(h1 + b1_ref[...], 0.0)        # stays in vregs (small)

    # ---- conv2 (3x3x3, stride 1, pad 1) + BN2 + ReLU ------------------------
    # Build the 27-tap im2col stack in VMEM scratch: each tap is a static lane
    # shift of h1 (wrap positions zeroed by a precomputed boundary mask), then
    # one MXU matmul over the full K = 27*planes contraction.
    for kd in range(3):
        for kh in range(3):
            for kw in range(3):
                t = (kd * 3 + kh) * 3 + kw
                off = (kd - 1) * HW + (kh - 1) * W + (kw - 1)
                if off == 0:
                    v = h1                          # center tap: no shift, no mask
                else:
                    k = off % DHW
                    # v[:, s] = h1[:, (s + off) % DHW]
                    v = jnp.concatenate([h1[:, k:], h1[:, :k]], axis=1)
                    v = v * mask_ref[t]             # zero out-of-bounds taps
                stack_ref[t * planes:(t + 1) * planes, :] = v

    h2 = jnp.dot(w2_ref[...], stack_ref[...], preferred_element_type=jnp.float32)
    h2 = jnp.maximum(h2 + b2_ref[...], 0.0)         # (planes, DHW)

    # ---- conv3 (1x1x1) + BN3 + residual add + ReLU --------------------------
    h3 = jnp.dot(w3_ref[...], h2, preferred_element_type=jnp.float32)  # (cexp, DHW)
    o_ref[0] = jnp.maximum(h3 + b3_ref[...] + x, 0.0).astype(o_ref.dtype)


# ---------------------------------------------------------------------------
# Host-side precomputation of the 27 "same"-padding boundary masks.
# ---------------------------------------------------------------------------
def _build_conv2_masks(D, H, W):
    d = np.arange(D)[:, None, None]
    h = np.arange(H)[None, :, None]
    w = np.arange(W)[None, None, :]
    masks = np.empty((27, 1, D * H * W), np.float32)
    for kd in range(3):
        for kh in range(3):
            for kw in range(3):
                t = (kd * 3 + kh) * 3 + kw
                m = ((d + kd - 1 >= 0) & (d + kd - 1 < D)
                     & (h + kh - 1 >= 0) & (h + kh - 1 < H)
                     & (w + kw - 1 >= 0) & (w + kw - 1 < W))
                masks[t, 0] = m.reshape(-1).astype(np.float32)
    return jnp.asarray(masks)


# ---------------------------------------------------------------------------
# Wrapper: NCDHW in -> NCDHW out (reshape only, no transposes, no padding).
# ---------------------------------------------------------------------------
def bottleneck_forward(x_ncdhw, kparams):
    N, C, D, H, W = x_ncdhw.shape
    DHW = D * H * W
    planes = kparams["w1"].shape[0]
    cexp = kparams["w3"].shape[0]
    assert cexp == C, "residual add requires inplanes == planes * expansion"

    x = x_ncdhw.reshape(N, C, DHW).astype(jnp.float32)
    masks = _build_conv2_masks(D, H, W)            # (27, 1, DHW) constant

    kern = partial(_bottleneck_kernel, D=D, H=H, W=W, planes=planes, cexp=cexp)
    out = pl.pallas_call(
        kern,
        out_shape=jax.ShapeDtypeStruct((N, cexp, DHW), jnp.float32),
        grid=(N,),
        in_specs=[
            pl.BlockSpec((1, C, DHW), lambda n: (n, 0, 0)),            # x (per batch)
            pl.BlockSpec((planes, C), lambda n: (0, 0)),               # w1 (BN1-folded)
            pl.BlockSpec((planes, 1), lambda n: (0, 0)),               # b1
            pl.BlockSpec((planes, 27 * planes), lambda n: (0, 0)),     # w2 (BN2-folded, im2col layout)
            pl.BlockSpec((planes, 1), lambda n: (0, 0)),               # b2
            pl.BlockSpec((cexp, planes), lambda n: (0, 0)),            # w3 (BN3-folded)
            pl.BlockSpec((cexp, 1), lambda n: (0, 0)),                 # b3
            pl.BlockSpec((27, 1, DHW), lambda n: (0, 0, 0)),           # boundary masks
        ],
        out_specs=pl.BlockSpec((1, cexp, DHW), lambda n: (n, 0, 0)),
        scratch_shapes=[pltpu.VMEM((27 * planes, DHW), jnp.float32)],  # im2col stack
        compiler_params=pltpu.CompilerParams(dimension_semantics=("parallel",)),
    )(x, kparams["w1"], kparams["b1"], kparams["w2"], kparams["b2"],
      kparams["w3"], kparams["b3"], masks)

    return out.reshape(N, cexp, D, H, W)


# ---------------------------------------------------------------------------
# BN folding (inference mode) + one-time weight prep into kernel layout.
# ---------------------------------------------------------------------------
def _fold_bn(gamma, beta, mean, var, eps=1e-5):
    scale = gamma / jnp.sqrt(var + eps)
    bias = beta - mean * scale
    return scale, bias


def prepare_kernel_params(params):
    s1, b1 = _fold_bn(*params["bn1"])
    s2, b2 = _fold_bn(*params["bn2"])
    s3, b3 = _fold_bn(*params["bn3"])

    w1 = params["w1"][:, :, 0, 0, 0]                    # (planes, inplanes)
    w2 = params["w2"]                                   # (planes, planes, 3, 3, 3)
    w3 = params["w3"][:, :, 0, 0, 0]                    # (planes*4, planes)
    planes = w1.shape[0]

    # Fold BN2 scale over cout, then lay out as (cout, tap*cin) to match the
    # in-kernel im2col stack order (tap-major, cin-minor, tap = (kd*3+kh)*3+kw).
    w2s = w2 * s2[:, None, None, None, None]            # (cout, cin, 3, 3, 3)
    w2_mat = jnp.transpose(w2s, (0, 2, 3, 4, 1)).reshape(planes, 27 * planes)

    return {
        "w1": (w1 * s1[:, None]).astype(jnp.float32),
        "b1": b1.reshape(-1, 1).astype(jnp.float32),
        "w2": w2_mat.astype(jnp.float32),
        "b2": b2.reshape(-1, 1).astype(jnp.float32),
        "w3": (w3 * s3[:, None]).astype(jnp.float32),
        "b3": b3.reshape(-1, 1).astype(jnp.float32),
    }


# ---------------------------------------------------------------------------
# Deterministic parameter init (PyTorch weight conventions).
# ---------------------------------------------------------------------------
def init_params(key, inplanes, planes):
    exp = 4
    ks = jax.random.split(key, 15)
    w1 = 0.1 * jax.random.normal(ks[0], (planes, inplanes, 1, 1, 1), jnp.float32)
    w2 = 0.1 * jax.random.normal(ks[1], (planes, planes, 3, 3, 3), jnp.float32)
    w3 = 0.1 * jax.random.normal(ks[2], (planes * exp, planes, 1, 1, 1), jnp.float32)

    def bn(kk, c):
        g = 1.0 + 0.1 * jax.random.normal(kk[0], (c,), jnp.float32)
        b = 0.1 * jax.random.normal(kk[1], (c,), jnp.float32)
        m = 0.1 * jax.random.normal(kk[2], (c,), jnp.float32)
        v = 1.0 + 0.5 * jax.random.uniform(kk[3], (c,), jnp.float32)
        return (g, b, m, v)

    return {
        "w1": w1, "w2": w2, "w3": w3,
        "bn1": bn(ks[3:7], planes),
        "bn2": bn(ks[7:11], planes),
        "bn3": bn(ks[11:15], planes * exp),
    }


# ---------------------------------------------------------------------------
# Pure-JAX reference (eval-mode BN), NCDHW throughout.
# ---------------------------------------------------------------------------
def reference_forward(x_ncdhw, params, eps=1e-5):
    hp = jax.lax.Precision.HIGHEST
    x = x_ncdhw.astype(jnp.float32)

    def bn(y, p):
        g, b, m, v = p
        sh = (1, -1, 1, 1, 1)
        return (y - m.reshape(sh)) / jnp.sqrt(v.reshape(sh) + eps) * g.reshape(sh) \
            + b.reshape(sh)

    y = jnp.einsum("oc,ncdhw->nodhw", params["w1"][:, :, 0, 0, 0], x, precision=hp)
    y = jnp.maximum(bn(y, params["bn1"]), 0.0)
    y = jax.lax.conv_general_dilated(
        y, params["w2"], window_strides=(1, 1, 1),
        padding=((1, 1), (1, 1), (1, 1)),
        dimension_numbers=("NCDHW", "OIDHW", "NCDHW"), precision=hp)
    y = jnp.maximum(bn(y, params["bn2"]), 0.0)
    y = jnp.einsum("oc,ncdhw->nodhw", params["w3"][:, :, 0, 0, 0], y, precision=hp)
    y = jnp.maximum(bn(y, params["bn3"]) + x, 0.0)
    return y


if __name__ == "__main__":
    key = jax.random.PRNGKey(0)
    kx, kp = jax.random.split(key)

    # Small shapes consistent with the module: residual add requires
    # inplanes == planes * expansion and stride == 1 (downsample=None).
    # planes=8 keeps the im2col stack rows 8-sublane aligned.
    N, INPLANES, D, H, W = 2, 32, 8, 8, 8
    PLANES = 8

    x = jax.random.normal(kx, (N, INPLANES, D, H, W), jnp.float32)   # NCDHW
    params = init_params(kp, INPLANES, PLANES)
    kparams = prepare_kernel_params(params)

    out = bottleneck_forward(x, kparams)
    out = jax.block_until_ready(out)

    ref = reference_forward(x, params)
    np.testing.assert_allclose(np.asarray(out), np.asarray(ref), rtol=2e-4, atol=2e-4)
    assert out.shape == (N, INPLANES, D, H, W)

    print("KERNEL_OK")
</pallas_src>

<mosaic_0001>
module attributes {stable_mosaic.version = 11 : i64} {
  func.func @_bottleneck_kernel(%arg0: i32, %arg1: memref<1x32x512xf32, #tpu.memory_space<vmem>>, %arg2: memref<8x32xf32, #tpu.memory_space<vmem>>, %arg3: memref<8x1xf32, #tpu.memory_space<vmem>>, %arg4: memref<8x216xf32, #tpu.memory_space<vmem>>, %arg5: memref<8x1xf32, #tpu.memory_space<vmem>>, %arg6: memref<32x8xf32, #tpu.memory_space<vmem>>, %arg7: memref<32x1xf32, #tpu.memory_space<vmem>>, %arg8: memref<27x1x512xf32, #tpu.memory_space<vmem>>, %arg9: memref<1x32x512xf32, #tpu.memory_space<vmem>>, %arg10: memref<216x512xf32, #tpu.memory_space<vmem>>) attributes {dimension_semantics = [#tpu.dimension_semantics<parallel>], iteration_bounds = array<i64: 2>, scalar_prefetch = 0 : i64, scratch_operands = 1 : i64, tpu.core_type = #tpu.core_type<tc>, window_params = [{transform_indices = @transform_0, window_bounds = array<i64: 1, 32, 512>}, {pipeline_mode = #tpu.pipeline_mode<synchronous>, transform_indices = @transform_1, window_bounds = array<i64: 8, 32>}, {pipeline_mode = #tpu.pipeline_mode<synchronous>, transform_indices = @transform_2, window_bounds = array<i64: 8, 1>}, {pipeline_mode = #tpu.pipeline_mode<synchronous>, transform_indices = @transform_3, window_bounds = array<i64: 8, 216>}, {pipeline_mode = #tpu.pipeline_mode<synchronous>, transform_indices = @transform_4, window_bounds = array<i64: 8, 1>}, {pipeline_mode = #tpu.pipeline_mode<synchronous>, transform_indices = @transform_5, window_bounds = array<i64: 32, 8>}, {pipeline_mode = #tpu.pipeline_mode<synchronous>, transform_indices = @transform_6, window_bounds = array<i64: 32, 1>}, {pipeline_mode = #tpu.pipeline_mode<synchronous>, transform_indices = @transform_7, window_bounds = array<i64: 27, 1, 512>}, {transform_indices = @transform_8, window_bounds = array<i64: 1, 32, 512>}]} {
    %c0 = arith.constant 0 : index
    %c0_0 = arith.constant 0 : index
    %c0_1 = arith.constant 0 : index
    %0 = vector.load %arg1[%c0, %c0_0, %c0_1] : memref<1x32x512xf32, #tpu.memory_space<vmem>>, vector<1x32x512xf32>
    %1 = vector.shape_cast %0 : vector<1x32x512xf32> to vector<32x512xf32>
    %c0_2 = arith.constant 0 : index
    %c0_3 = arith.constant 0 : index
    %2 = vector.load %arg2[%c0_2, %c0_3] : memref<8x32xf32, #tpu.memory_space<vmem>>, vector<8x32xf32>
    %cst = arith.constant dense<0.000000e+00> : vector<8x512xf32>
    %3 = tpu.matmul %2, %1, %cst {dimension_numbers = #tpu.dot_dimension_numbers<[1], [0], [0], [1], [0, 0, 1, 1], [], []>} : vector<8x32xf32>, vector<32x512xf32>, vector<8x512xf32> -> vector<8x512xf32>
    %c0_4 = arith.constant 0 : index
    %c0_5 = arith.constant 0 : index
    %4 = vector.load %arg3[%c0_4, %c0_5] : memref<8x1xf32, #tpu.memory_space<vmem>>, vector<8x1xf32>
    %5 = vector.broadcast %4 : vector<8x1xf32> to vector<8x512xf32>
    %6 = arith.addf %3, %5 : vector<8x512xf32>
    %cst_6 = arith.constant 0.000000e+00 : f32
    %7 = vector.broadcast %cst_6 : f32 to vector<8x512xf32>
    %8 = arith.maximumf %6, %7 : vector<8x512xf32>
    %9 = vector.extract_strided_slice %8 {offsets = [0, 439], sizes = [8, 73], strides = [1, 1]} : vector<8x512xf32> to vector<8x73xf32>
    %10 = vector.extract_strided_slice %8 {offsets = [0, 0], sizes = [8, 439], strides = [1, 1]} : vector<8x512xf32> to vector<8x439xf32>
    %11 = tpu.concatenate %9, %10 in 1 : vector<8x73xf32>, vector<8x439xf32> -> vector<8x512xf32>
    %c0_7 = arith.constant 0 : index
    %c0_8 = arith.constant 0 : index
    %c0_9 = arith.constant 0 : index
    %12 = vector.load %arg8[%c0_7, %c0_8, %c0_9] : memref<27x1x512xf32, #tpu.memory_space<vmem>>, vector<1x1x512xf32>
    %13 = vector.shape_cast %12 : vector<1x1x512xf32> to vector<1x512xf32>
    %14 = vector.broadcast %13 : vector<1x512xf32> to vector<8x512xf32>
    %15 = arith.mulf %11, %14 : vector<8x512xf32>
    %c0_10 = arith.constant 0 : index
    %c0_11 = arith.constant 0 : index
    %16 = vector.load %arg10[%c0_10, %c0_11] : memref<216x512xf32, #tpu.memory_space<vmem>>, vector<8x512xf32>
    tpu.vector_store %arg10[%c0_10, %c0_11], %15 {strides = array<i32>} : memref<216x512xf32, #tpu.memory_space<vmem>>, vector<8x512xf32>,
    %17 = vector.extract_strided_slice %8 {offsets = [0, 440], sizes = [8, 72], strides = [1, 1]} : vector<8x512xf32> to vector<8x72xf32>
    %18 = vector.extract_strided_slice %8 {offsets = [0, 0], sizes = [8, 440], strides = [1, 1]} : vector<8x512xf32> to vector<8x440xf32>
    %19 = tpu.concatenate %17, %18 in 1 : vector<8x72xf32>, vector<8x440xf32> -> vector<8x512xf32>
    %c1 = arith.constant 1 : index
    %c0_12 = arith.constant 0 : index
    %c0_13 = arith.constant 0 : index
    %20 = vector.load %arg8[%c1, %c0_12, %c0_13] : memref<27x1x512xf32, #tpu.memory_space<vmem>>, vector<1x1x512xf32>
    %21 = vector.shape_cast %20 : vector<1x1x512xf32> to vector<1x512xf32>
    %22 = vector.broadcast %21 : vector<1x512xf32> to vector<8x512xf32>
    %23 = arith.mulf %19, %22 : vector<8x512xf32>
    %c8 = arith.constant 8 : index
    %c0_14 = arith.constant 0 : index
    %24 = vector.load %arg10[%c8, %c0_14] : memref<216x512xf32, #tpu.memory_space<vmem>>, vector<8x512xf32>
    tpu.vector_store %arg10[%c8, %c0_14], %23 {strides = array<i32>} : memref<216x512xf32, #tpu.memory_space<vmem>>, vector<8x512xf32>,
    %25 = vector.extract_strided_slice %8 {offsets = [0, 441], sizes = [8, 71], strides = [1, 1]} : vector<8x512xf32> to vector<8x71xf32>
    %26 = vector.extract_strided_slice %8 {offsets = [0, 0], sizes = [8, 441], strides = [1, 1]} : vector<8x512xf32> to vector<8x441xf32>
    %27 = tpu.concatenate %25, %26 in 1 : vector<8x71xf32>, vector<8x441xf32> -> vector<8x512xf32>
    %c2 = arith.constant 2 : index
    %c0_15 = arith.constant 0 : index
    %c0_16 = arith.constant 0 : index
    %28 = vector.load %arg8[%c2, %c0_15, %c0_16] : memref<27x1x512xf32, #tpu.memory_space<vmem>>, vector<1x1x512xf32>
    %29 = vector.shape_cast %28 : vector<1x1x512xf32> to vector<1x512xf32>
    %30 = vector.broadcast %29 : vector<1x512xf32> to vector<8x512xf32>
    %31 = arith.mulf %27, %30 : vector<8x512xf32>
    %c16 = arith.constant 16 : index
    %c0_17 = arith.constant 0 : index
    %32 = vector.load %arg10[%c16, %c0_17] : memref<216x512xf32, #tpu.memory_space<vmem>>, vector<8x512xf32>
    tpu.vector_store %arg10[%c16, %c0_17], %31 {strides = array<i32>} : memref<216x512xf32, #tpu.memory_space<vmem>>, vector<8x512xf32>,
    %33 = vector.extract_strided_slice %8 {offsets = [0, 447], sizes = [8, 65], strides = [1, 1]} : vector<8x512xf32> to vector<8x65xf32>
    %34 = vector.extract_strided_slice %8 {offsets = [0, 0], sizes = [8, 447], strides = [1, 1]} : vector<8x512xf32> to vector<8x447xf32>
    %35 = tpu.concatenate %33, %34 in 1 : vector<8x65xf32>, vector<8x447xf32> -> vector<8x512xf32>
    %c3 = arith.constant 3 : index
    %c0_18 = arith.constant 0 : index
    %c0_19 = arith.constant 0 : index
    %36 = vector.load %arg8[%c3, %c0_18, %c0_19] : memref<27x1x512xf32, #tpu.memory_space<vmem>>, vector<1x1x512xf32>
    %37 = vector.shape_cast %36 : vector<1x1x512xf32> to vector<1x512xf32>
    %38 = vector.broadcast %37 : vector<1x512xf32> to vector<8x512xf32>
    %39 = arith.mulf %35, %38 : vector<8x512xf32>
    %c24 = arith.constant 24 : index
    %c0_20 = arith.constant 0 : index
    %40 = vector.load %arg10[%c24, %c0_20] : memref<216x512xf32, #tpu.memory_space<vmem>>, vector<8x512xf32>
    tpu.vector_store %arg10[%c24, %c0_20], %39 {strides = array<i32>} : memref<216x512xf32, #tpu.memory_space<vmem>>, vector<8x512xf32>,
    %41 = vector.extract_strided_slice %8 {offsets = [0, 448], sizes = [8, 64], strides = [1, 1]} : vector<8x512xf32> to vector<8x64xf32>
    %42 = vector.extract_strided_slice %8 {offsets = [0, 0], sizes = [8, 448], strides = [1, 1]} : vector<8x512xf32> to vector<8x448xf32>
    %43 = tpu.concatenate %41, %42 in 1 : vector<8x64xf32>, vector<8x448xf32> -> vector<8x512xf32>
    %c4 = arith.constant 4 : index
    %c0_21 = arith.constant 0 : index
    %c0_22 = arith.constant 0 : index
    %44 = vector.load %arg8[%c4, %c0_21, %c0_22] : memref<27x1x512xf32, #tpu.memory_space<vmem>>, vector<1x1x512xf32>
    %45 = vector.shape_cast %44 : vector<1x1x512xf32> to vector<1x512xf32>
    %46 = vector.broadcast %45 : vector<1x512xf32> to vector<8x512xf32>
    %47 = arith.mulf %43, %46 : vector<8x512xf32>
    %c32 = arith.constant 32 : index
    %c0_23 = arith.constant 0 : index
    %48 = vector.load %arg10[%c32, %c0_23] : memref<216x512xf32, #tpu.memory_space<vmem>>, vector<8x512xf32>
    tpu.vector_store %arg10[%c32, %c0_23], %47 {strides = array<i32>} : memref<216x512xf32, #tpu.memory_space<vmem>>, vector<8x512xf32>,
    %49 = vector.extract_strided_slice %8 {offsets = [0, 449], sizes = [8, 63], strides = [1, 1]} : vector<8x512xf32> to vector<8x63xf32>
    %50 = vector.extract_strided_slice %8 {offsets = [0, 0], sizes = [8, 449], strides = [1, 1]} : vector<8x512xf32> to vector<8x449xf32>
    %51 = tpu.concatenate %49, %50 in 1 : vector<8x63xf32>, vector<8x449xf32> -> vector<8x512xf32>
    %c5 = arith.constant 5 : index
    %c0_24 = arith.constant 0 : index
    %c0_25 = arith.constant 0 : index
    %52 = vector.load %arg8[%c5, %c0_24, %c0_25] : memref<27x1x512xf32, #tpu.memory_space<vmem>>, vector<1x1x512xf32>
    %53 = vector.shape_cast %52 : vector<1x1x512xf32> to vector<1x512xf32>
    %54 = vector.broadcast %53 : vector<1x512xf32> to vector<8x512xf32>
    %55 = arith.mulf %51, %54 : vector<8x512xf32>
    %c40 = arith.constant 40 : index
    %c0_26 = arith.constant 0 : index
    %56 = vector.load %arg10[%c40, %c0_26] : memref<216x512xf32, #tpu.memory_space<vmem>>, vector<8x512xf32>
    tpu.vector_store %arg10[%c40, %c0_26], %55 {strides = array<i32>} : memref<216x512xf32, #tpu.memory_space<vmem>>, vector<8x512xf32>,
    %57 = vector.extract_strided_slice %8 {offsets = [0, 455], sizes = [8, 57], strides = [1, 1]} : vector<8x512xf32> to vector<8x57xf32>
    %58 = vector.extract_strided_slice %8 {offsets = [0, 0], sizes = [8, 455], strides = [1, 1]} : vector<8x512xf32> to vector<8x455xf32>
    %59 = tpu.concatenate %57, %58 in 1 : vector<8x57xf32>, vector<8x455xf32> -> vector<8x512xf32>
    %c6 = arith.constant 6 : index
    %c0_27 = arith.constant 0 : index
    %c0_28 = arith.constant 0 : index
    %60 = vector.load %arg8[%c6, %c0_27, %c0_28] : memref<27x1x512xf32, #tpu.memory_space<vmem>>, vector<1x1x512xf32>
    %61 = vector.shape_cast %60 : vector<1x1x512xf32> to vector<1x512xf32>
    %62 = vector.broadcast %61 : vector<1x512xf32> to vector<8x512xf32>
    %63 = arith.mulf %59, %62 : vector<8x512xf32>
    %c48 = arith.constant 48 : index
    %c0_29 = arith.constant 0 : index
    %64 = vector.load %arg10[%c48, %c0_29] : memref<216x512xf32, #tpu.memory_space<vmem>>, vector<8x512xf32>
    tpu.vector_store %arg10[%c48, %c0_29], %63 {strides = array<i32>} : memref<216x512xf32, #tpu.memory_space<vmem>>, vector<8x512xf32>,
    %65 = vector.extract_strided_slice %8 {offsets = [0, 456], sizes = [8, 56], strides = [1, 1]} : vector<8x512xf32> to vector<8x56xf32>
    %66 = vector.extract_strided_slice %8 {offsets = [0, 0], sizes = [8, 456], strides = [1, 1]} : vector<8x512xf32> to vector<8x456xf32>
    %67 = tpu.concatenate %65, %66 in 1 : vector<8x56xf32>, vector<8x456xf32> -> vector<8x512xf32>
    %c7 = arith.constant 7 : index
    %c0_30 = arith.constant 0 : index
    %c0_31 = arith.constant 0 : index
    %68 = vector.load %arg8[%c7, %c0_30, %c0_31] : memref<27x1x512xf32, #tpu.memory_space<vmem>>, vector<1x1x512xf32>
    %69 = vector.shape_cast %68 : vector<1x1x512xf32> to vector<1x512xf32>
    %70 = vector.broadcast %69 : vector<1x512xf32> to vector<8x512xf32>
    %71 = arith.mulf %67, %70 : vector<8x512xf32>
    %c56 = arith.constant 56 : index
    %c0_32 = arith.constant 0 : index
    %72 = vector.load %arg10[%c56, %c0_32] : memref<216x512xf32, #tpu.memory_space<vmem>>, vector<8x512xf32>
    tpu.vector_store %arg10[%c56, %c0_32], %71 {strides = array<i32>} : memref<216x512xf32, #tpu.memory_space<vmem>>, vector<8x512xf32>,
    %73 = vector.extract_strided_slice %8 {offsets = [0, 457], sizes = [8, 55], strides = [1, 1]} : vector<8x512xf32> to vector<8x55xf32>
    %74 = vector.extract_strided_slice %8 {offsets = [0, 0], sizes = [8, 457], strides = [1, 1]} : vector<8x512xf32> to vector<8x457xf32>
    %75 = tpu.concatenate %73, %74 in 1 : vector<8x55xf32>, vector<8x457xf32> -> vector<8x512xf32>
    %c8_33 = arith.constant 8 : index
    %c0_34 = arith.constant 0 : index
    %c0_35 = arith.constant 0 : index
    %76 = vector.load %arg8[%c8_33, %c0_34, %c0_35] : memref<27x1x512xf32, #tpu.memory_space<vmem>>, vector<1x1x512xf32>
    %77 = vector.shape_cast %76 : vector<1x1x512xf32> to vector<1x512xf32>
    %78 = vector.broadcast %77 : vector<1x512xf32> to vector<8x512xf32>
    %79 = arith.mulf %75, %78 : vector<8x512xf32>
    %c64 = arith.constant 64 : index
    %c0_36 = arith.constant 0 : index
    %80 = vector.load %arg10[%c64, %c0_36] : memref<216x512xf32, #tpu.memory_space<vmem>>, vector<8x512xf32>
    tpu.vector_store %arg10[%c64, %c0_36], %79 {strides = array<i32>} : memref<216x512xf32, #tpu.memory_space<vmem>>, vector<8x512xf32>,
    %81 = vector.extract_strided_slice %8 {offsets = [0, 503], sizes = [8, 9], strides = [1, 1]} : vector<8x512xf32> to vector<8x9xf32>
    %82 = vector.extract_strided_slice %8 {offsets = [0, 0], sizes = [8, 503], strides = [1, 1]} : vector<8x512xf32> to vector<8x503xf32>
    %83 = tpu.concatenate %81, %82 in 1 : vector<8x9xf32>, vector<8x503xf32> -> vector<8x512xf32>
    %c9 = arith.constant 9 : index
    %c0_37 = arith.constant 0 : index
    %c0_38 = arith.constant 0 : index
    %84 = vector.load %arg8[%c9, %c0_37, %c0_38] : memref<27x1x512xf32, #tpu.memory_space<vmem>>, vector<1x1x512xf32>
    %85 = vector.shape_cast %84 : vector<1x1x512xf32> to vector<1x512xf32>
    %86 = vector.broadcast %85 : vector<1x512xf32> to vector<8x512xf32>
    %87 = arith.mulf %83, %86 : vector<8x512xf32>
    %c72 = arith.constant 72 : index
    %c0_39 = arith.constant 0 : index
    %88 = vector.load %arg10[%c72, %c0_39] : memref<216x512xf32, #tpu.memory_space<vmem>>, vector<8x512xf32>
    tpu.vector_store %arg10[%c72, %c0_39], %87 {strides = array<i32>} : memref<216x512xf32, #tpu.memory_space<vmem>>, vector<8x512xf32>,
    %89 = vector.extract_strided_slice %8 {offsets = [0, 504], sizes = [8, 8], strides = [1, 1]} : vector<8x512xf32> to vector<8x8xf32>
    %90 = vector.extract_strided_slice %8 {offsets = [0, 0], sizes = [8, 504], strides = [1, 1]} : vector<8x512xf32> to vector<8x504xf32>
    %91 = tpu.concatenate %89, %90 in 1 : vector<8x8xf32>, vector<8x504xf32> -> vector<8x512xf32>
    %c10 = arith.constant 10 : index
    %c0_40 = arith.constant 0 : index
    %c0_41 = arith.constant 0 : index
    %92 = vector.load %arg8[%c10, %c0_40, %c0_41] : memref<27x1x512xf32, #tpu.memory_space<vmem>>, vector<1x1x512xf32>
    %93 = vector.shape_cast %92 : vector<1x1x512xf32> to vector<1x512xf32>
    %94 = vector.broadcast %93 : vector<1x512xf32> to vector<8x512xf32>
    %95 = arith.mulf %91, %94 : vector<8x512xf32>
    %c80 = arith.constant 80 : index
    %c0_42 = arith.constant 0 : index
    %96 = vector.load %arg10[%c80, %c0_42] : memref<216x512xf32, #tpu.memory_space<vmem>>, vector<8x512xf32>
    tpu.vector_store %arg10[%c80, %c0_42], %95 {strides = array<i32>} : memref<216x512xf32, #tpu.memory_space<vmem>>, vector<8x512xf32>,
    %97 = vector.extract_strided_slice %8 {offsets = [0, 505], sizes = [8, 7], strides = [1, 1]} : vector<8x512xf32> to vector<8x7xf32>
    %98 = vector.extract_strided_slice %8 {offsets = [0, 0], sizes = [8, 505], strides = [1, 1]} : vector<8x512xf32> to vector<8x505xf32>
    %99 = tpu.concatenate %97, %98 in 1 : vector<8x7xf32>, vector<8x505xf32> -> vector<8x512xf32>
    %c11 = arith.constant 11 : index
    %c0_43 = arith.constant 0 : index
    %c0_44 = arith.constant 0 : index
    %100 = vector.load %arg8[%c11, %c0_43, %c0_44] : memref<27x1x512xf32, #tpu.memory_space<vmem>>, vector<1x1x512xf32>
    %101 = vector.shape_cast %100 : vector<1x1x512xf32> to vector<1x512xf32>
    %102 = vector.broadcast %101 : vector<1x512xf32> to vector<8x512xf32>
    %103 = arith.mulf %99, %102 : vector<8x512xf32>
    %c88 = arith.constant 88 : index
    %c0_45 = arith.constant 0 : index
    %104 = vector.load %arg10[%c88, %c0_45] : memref<216x512xf32, #tpu.memory_space<vmem>>, vector<8x512xf32>
    tpu.vector_store %arg10[%c88, %c0_45], %103 {strides = array<i32>} : memref<216x512xf32, #tpu.memory_space<vmem>>, vector<8x512xf32>,
    %105 = vector.extract_strided_slice %8 {offsets = [0, 511], sizes = [8, 1], strides = [1, 1]} : vector<8x512xf32> to vector<8x1xf32>
    %106 = vector.extract_strided_slice %8 {offsets = [0, 0], sizes = [8, 511], strides = [1, 1]} : vector<8x512xf32> to vector<8x511xf32>
    %107 = tpu.concatenate %105, %106 in 1 : vector<8x1xf32>, vector<8x511xf32> -> vector<8x512xf32>
    %c12 = arith.constant 12 : index
    %c0_46 = arith.constant 0 : index
    %c0_47 = arith.constant 0 : index
    %108 = vector.load %arg8[%c12, %c0_46, %c0_47] : memref<27x1x512xf32, #tpu.memory_space<vmem>>, vector<1x1x512xf32>
    %109 = vector.shape_cast %108 : vector<1x1x512xf32> to vector<1x512xf32>
    %110 = vector.broadcast %109 : vector<1x512xf32> to vector<8x512xf32>
    %111 = arith.mulf %107, %110 : vector<8x512xf32>
    %c96 = arith.constant 96 : index
    %c0_48 = arith.constant 0 : index
    %112 = vector.load %arg10[%c96, %c0_48] : memref<216x512xf32, #tpu.memory_space<vmem>>, vector<8x512xf32>
    tpu.vector_store %arg10[%c96, %c0_48], %111 {strides = array<i32>} : memref<216x512xf32, #tpu.memory_space<vmem>>, vector<8x512xf32>,
    %c104 = arith.constant 104 : index
    %c0_49 = arith.constant 0 : index
    %113 = vector.load %arg10[%c104, %c0_49] : memref<216x512xf32, #tpu.memory_space<vmem>>, vector<8x512xf32>
    tpu.vector_store %arg10[%c104, %c0_49], %8 {strides = array<i32>} : memref<216x512xf32, #tpu.memory_space<vmem>>, vector<8x512xf32>,
    %114 = vector.extract_strided_slice %8 {offsets = [0, 1], sizes = [8, 511], strides = [1, 1]} : vector<8x512xf32> to vector<8x511xf32>
    %115 = vector.extract_strided_slice %8 {offsets = [0, 0], sizes = [8, 1], strides = [1, 1]} : vector<8x512xf32> to vector<8x1xf32>
    %116 = tpu.concatenate %114, %115 in 1 : vector<8x511xf32>, vector<8x1xf32> -> vector<8x512xf32>
    %c14 = arith.constant 14 : index
    %c0_50 = arith.constant 0 : index
    %c0_51 = arith.constant 0 : index
    %117 = vector.load %arg8[%c14, %c0_50, %c0_51] : memref<27x1x512xf32, #tpu.memory_space<vmem>>, vector<1x1x512xf32>
    %118 = vector.shape_cast %117 : vector<1x1x512xf32> to vector<1x512xf32>
    %119 = vector.broadcast %118 : vector<1x512xf32> to vector<8x512xf32>
    %120 = arith.mulf %116, %119 : vector<8x512xf32>
    %c112 = arith.constant 112 : index
    %c0_52 = arith.constant 0 : index
    %121 = vector.load %arg10[%c112, %c0_52] : memref<216x512xf32, #tpu.memory_space<vmem>>, vector<8x512xf32>
    tpu.vector_store %arg10[%c112, %c0_52], %120 {strides = array<i32>} : memref<216x512xf32, #tpu.memory_space<vmem>>, vector<8x512xf32>,
    %122 = vector.extract_strided_slice %8 {offsets = [0, 7], sizes = [8, 505], strides = [1, 1]} : vector<8x512xf32> to vector<8x505xf32>
    %123 = vector.extract_strided_slice %8 {offsets = [0, 0], sizes = [8, 7], strides = [1, 1]} : vector<8x512xf32> to vector<8x7xf32>
    %124 = tpu.concatenate %122, %123 in 1 : vector<8x505xf32>, vector<8x7xf32> -> vector<8x512xf32>
    %c15 = arith.constant 15 : index
    %c0_53 = arith.constant 0 : index
    %c0_54 = arith.constant 0 : index
    %125 = vector.load %arg8[%c15, %c0_53, %c0_54] : memref<27x1x512xf32, #tpu.memory_space<vmem>>, vector<1x1x512xf32>
    %126 = vector.shape_cast %125 : vector<1x1x512xf32> to vector<1x512xf32>
    %127 = vector.broadcast %126 : vector<1x512xf32> to vector<8x512xf32>
    %128 = arith.mulf %124, %127 : vector<8x512xf32>
    %c120 = arith.constant 120 : index
    %c0_55 = arith.constant 0 : index
    %129 = vector.load %arg10[%c120, %c0_55] : memref<216x512xf32, #tpu.memory_space<vmem>>, vector<8x512xf32>
    tpu.vector_store %arg10[%c120, %c0_55], %128 {strides = array<i32>} : memref<216x512xf32, #tpu.memory_space<vmem>>, vector<8x512xf32>,
    %130 = vector.extract_strided_slice %8 {offsets = [0, 8], sizes = [8, 504], strides = [1, 1]} : vector<8x512xf32> to vector<8x504xf32>
    %131 = vector.extract_strided_slice %8 {offsets = [0, 0], sizes = [8, 8], strides = [1, 1]} : vector<8x512xf32> to vector<8x8xf32>
    %132 = tpu.concatenate %130, %131 in 1 : vector<8x504xf32>, vector<8x8xf32> -> vector<8x512xf32>
    %c16_56 = arith.constant 16 : index
    %c0_57 = arith.constant 0 : index
    %c0_58 = arith.constant 0 : index
    %133 = vector.load %arg8[%c16_56, %c0_57, %c0_58] : memref<27x1x512xf32, #tpu.memory_space<vmem>>, vector<1x1x512xf32>
    %134 = vector.shape_cast %133 : vector<1x1x512xf32> to vector<1x512xf32>
    %135 = vector.broadcast %134 : vector<1x512xf32> to vector<8x512xf32>
    %136 = arith.mulf %132, %135 : vector<8x512xf32>
    %c128 = arith.constant 128 : index
    %c0_59 = arith.constant 0 : index
    %137 = vector.load %arg10[%c128, %c0_59] : memref<216x512xf32, #tpu.memory_space<vmem>>, vector<8x512xf32>
    tpu.vector_store %arg10[%c128, %c0_59], %136 {strides = array<i32>} : memref<216x512xf32, #tpu.memory_space<vmem>>, vector<8x512xf32>,
    %138 = vector.extract_strided_slice %8 {offsets = [0, 9], sizes = [8, 503], strides = [1, 1]} : vector<8x512xf32> to vector<8x503xf32>
    %139 = vector.extract_strided_slice %8 {offsets = [0, 0], sizes = [8, 9], strides = [1, 1]} : vector<8x512xf32> to vector<8x9xf32>
    %140 = tpu.concatenate %138, %139 in 1 : vector<8x503xf32>, vector<8x9xf32> -> vector<8x512xf32>
    %c17 = arith.constant 17 : index
    %c0_60 = arith.constant 0 : index
    %c0_61 = arith.constant 0 : index
    %141 = vector.load %arg8[%c17, %c0_60, %c0_61] : memref<27x1x512xf32, #tpu.memory_space<vmem>>, vector<1x1x512xf32>
    %142 = vector.shape_cast %141 : vector<1x1x512xf32> to vector<1x512xf32>
    %143 = vector.broadcast %142 : vector<1x512xf32> to vector<8x512xf32>
    %144 = arith.mulf %140, %143 : vector<8x512xf32>
    %c136 = arith.constant 136 : index
    %c0_62 = arith.constant 0 : index
    %145 = vector.load %arg10[%c136, %c0_62] : memref<216x512xf32, #tpu.memory_space<vmem>>, vector<8x512xf32>
    tpu.vector_store %arg10[%c136, %c0_62], %144 {strides = array<i32>} : memref<216x512xf32, #tpu.memory_space<vmem>>, vector<8x512xf32>,
    %146 = vector.extract_strided_slice %8 {offsets = [0, 55], sizes = [8, 457], strides = [1, 1]} : vector<8x512xf32> to vector<8x457xf32>
    %147 = vector.extract_strided_slice %8 {offsets = [0, 0], sizes = [8, 55], strides = [1, 1]} : vector<8x512xf32> to vector<8x55xf32>
    %148 = tpu.concatenate %146, %147 in 1 : vector<8x457xf32>, vector<8x55xf32> -> vector<8x512xf32>
    %c18 = arith.constant 18 : index
    %c0_63 = arith.constant 0 : index
    %c0_64 = arith.constant 0 : index
    %149 = vector.load %arg8[%c18, %c0_63, %c0_64] : memref<27x1x512xf32, #tpu.memory_space<vmem>>, vector<1x1x512xf32>
    %150 = vector.shape_cast %149 : vector<1x1x512xf32> to vector<1x512xf32>
    %151 = vector.broadcast %150 : vector<1x512xf32> to vector<8x512xf32>
    %152 = arith.mulf %148, %151 : vector<8x512xf32>
    %c144 = arith.constant 144 : index
    %c0_65 = arith.constant 0 : index
    %153 = vector.load %arg10[%c144, %c0_65] : memref<216x512xf32, #tpu.memory_space<vmem>>, vector<8x512xf32>
    tpu.vector_store %arg10[%c144, %c0_65], %152 {strides = array<i32>} : memref<216x512xf32, #tpu.memory_space<vmem>>, vector<8x512xf32>,
    %154 = vector.extract_strided_slice %8 {offsets = [0, 56], sizes = [8, 456], strides = [1, 1]} : vector<8x512xf32> to vector<8x456xf32>
    %155 = vector.extract_strided_slice %8 {offsets = [0, 0], sizes = [8, 56], strides = [1, 1]} : vector<8x512xf32> to vector<8x56xf32>
    %156 = tpu.concatenate %154, %155 in 1 : vector<8x456xf32>, vector<8x56xf32> -> vector<8x512xf32>
    %c19 = arith.constant 19 : index
    %c0_66 = arith.constant 0 : index
    %c0_67 = arith.constant 0 : index
    %157 = vector.load %arg8[%c19, %c0_66, %c0_67] : memref<27x1x512xf32, #tpu.memory_space<vmem>>, vector<1x1x512xf32>
    %158 = vector.shape_cast %157 : vector<1x1x512xf32> to vector<1x512xf32>
    %159 = vector.broadcast %158 : vector<1x512xf32> to vector<8x512xf32>
    %160 = arith.mulf %156, %159 : vector<8x512xf32>
    %c152 = arith.constant 152 : index
    %c0_68 = arith.constant 0 : index
    %161 = vector.load %arg10[%c152, %c0_68] : memref<216x512xf32, #tpu.memory_space<vmem>>, vector<8x512xf32>
    tpu.vector_store %arg10[%c152, %c0_68], %160 {strides = array<i32>} : memref<216x512xf32, #tpu.memory_space<vmem>>, vector<8x512xf32>,
    %162 = vector.extract_strided_slice %8 {offsets = [0, 57], sizes = [8, 455], strides = [1, 1]} : vector<8x512xf32> to vector<8x455xf32>
    %163 = vector.extract_strided_slice %8 {offsets = [0, 0], sizes = [8, 57], strides = [1, 1]} : vector<8x512xf32> to vector<8x57xf32>
    %164 = tpu.concatenate %162, %163 in 1 : vector<8x455xf32>, vector<8x57xf32> -> vector<8x512xf32>
    %c20 = arith.constant 20 : index
    %c0_69 = arith.constant 0 : index
    %c0_70 = arith.constant 0 : index
    %165 = vector.load %arg8[%c20, %c0_69, %c0_70] : memref<27x1x512xf32, #tpu.memory_space<vmem>>, vector<1x1x512xf32>
    %166 = vector.shape_cast %165 : vector<1x1x512xf32> to vector<1x512xf32>
    %167 = vector.broadcast %166 : vector<1x512xf32> to vector<8x512xf32>
    %168 = arith.mulf %164, %167 : vector<8x512xf32>
    %c160 = arith.constant 160 : index
    %c0_71 = arith.constant 0 : index
    %169 = vector.load %arg10[%c160, %c0_71] : memref<216x512xf32, #tpu.memory_space<vmem>>, vector<8x512xf32>
    tpu.vector_store %arg10[%c160, %c0_71], %168 {strides = array<i32>} : memref<216x512xf32, #tpu.memory_space<vmem>>, vector<8x512xf32>,
    %170 = vector.extract_strided_slice %8 {offsets = [0, 63], sizes = [8, 449], strides = [1, 1]} : vector<8x512xf32> to vector<8x449xf32>
    %171 = vector.extract_strided_slice %8 {offsets = [0, 0], sizes = [8, 63], strides = [1, 1]} : vector<8x512xf32> to vector<8x63xf32>
    %172 = tpu.concatenate %170, %171 in 1 : vector<8x449xf32>, vector<8x63xf32> -> vector<8x512xf32>
    %c21 = arith.constant 21 : index
    %c0_72 = arith.constant 0 : index
    %c0_73 = arith.constant 0 : index
    %173 = vector.load %arg8[%c21, %c0_72, %c0_73] : memref<27x1x512xf32, #tpu.memory_space<vmem>>, vector<1x1x512xf32>
    %174 = vector.shape_cast %173 : vector<1x1x512xf32> to vector<1x512xf32>
    %175 = vector.broadcast %174 : vector<1x512xf32> to vector<8x512xf32>
    %176 = arith.mulf %172, %175 : vector<8x512xf32>
    %c168 = arith.constant 168 : index
    %c0_74 = arith.constant 0 : index
    %177 = vector.load %arg10[%c168, %c0_74] : memref<216x512xf32, #tpu.memory_space<vmem>>, vector<8x512xf32>
    tpu.vector_store %arg10[%c168, %c0_74], %176 {strides = array<i32>} : memref<216x512xf32, #tpu.memory_space<vmem>>, vector<8x512xf32>,
    %178 = vector.extract_strided_slice %8 {offsets = [0, 64], sizes = [8, 448], strides = [1, 1]} : vector<8x512xf32> to vector<8x448xf32>
    %179 = vector.extract_strided_slice %8 {offsets = [0, 0], sizes = [8, 64], strides = [1, 1]} : vector<8x512xf32> to vector<8x64xf32>
    %180 = tpu.concatenate %178, %179 in 1 : vector<8x448xf32>, vector<8x64xf32> -> vector<8x512xf32>
    %c22 = arith.constant 22 : index
    %c0_75 = arith.constant 0 : index
    %c0_76 = arith.constant 0 : index
    %181 = vector.load %arg8[%c22, %c0_75, %c0_76] : memref<27x1x512xf32, #tpu.memory_space<vmem>>, vector<1x1x512xf32>
    %182 = vector.shape_cast %181 : vector<1x1x512xf32> to vector<1x512xf32>
    %183 = vector.broadcast %182 : vector<1x512xf32> to vector<8x512xf32>
    %184 = arith.mulf %180, %183 : vector<8x512xf32>
    %c176 = arith.constant 176 : index
    %c0_77 = arith.constant 0 : index
    %185 = vector.load %arg10[%c176, %c0_77] : memref<216x512xf32, #tpu.memory_space<vmem>>, vector<8x512xf32>
    tpu.vector_store %arg10[%c176, %c0_77], %184 {strides = array<i32>} : memref<216x512xf32, #tpu.memory_space<vmem>>, vector<8x512xf32>,
    %186 = vector.extract_strided_slice %8 {offsets = [0, 65], sizes = [8, 447], strides = [1, 1]} : vector<8x512xf32> to vector<8x447xf32>
    %187 = vector.extract_strided_slice %8 {offsets = [0, 0], sizes = [8, 65], strides = [1, 1]} : vector<8x512xf32> to vector<8x65xf32>
    %188 = tpu.concatenate %186, %187 in 1 : vector<8x447xf32>, vector<8x65xf32> -> vector<8x512xf32>
    %c23 = arith.constant 23 : index
    %c0_78 = arith.constant 0 : index
    %c0_79 = arith.constant 0 : index
    %189 = vector.load %arg8[%c23, %c0_78, %c0_79] : memref<27x1x512xf32, #tpu.memory_space<vmem>>, vector<1x1x512xf32>
    %190 = vector.shape_cast %189 : vector<1x1x512xf32> to vector<1x512xf32>
    %191 = vector.broadcast %190 : vector<1x512xf32> to vector<8x512xf32>
    %192 = arith.mulf %188, %191 : vector<8x512xf32>
    %c184 = arith.constant 184 : index
    %c0_80 = arith.constant 0 : index
    %193 = vector.load %arg10[%c184, %c0_80] : memref<216x512xf32, #tpu.memory_space<vmem>>, vector<8x512xf32>
    tpu.vector_store %arg10[%c184, %c0_80], %192 {strides = array<i32>} : memref<216x512xf32, #tpu.memory_space<vmem>>, vector<8x512xf32>,
    %194 = vector.extract_strided_slice %8 {offsets = [0, 71], sizes = [8, 441], strides = [1, 1]} : vector<8x512xf32> to vector<8x441xf32>
    %195 = vector.extract_strided_slice %8 {offsets = [0, 0], sizes = [8, 71], strides = [1, 1]} : vector<8x512xf32> to vector<8x71xf32>
    %196 = tpu.concatenate %194, %195 in 1 : vector<8x441xf32>, vector<8x71xf32> -> vector<8x512xf32>
    %c24_81 = arith.constant 24 : index
    %c0_82 = arith.constant 0 : index
    %c0_83 = arith.constant 0 : index
    %197 = vector.load %arg8[%c24_81, %c0_82, %c0_83] : memref<27x1x512xf32, #tpu.memory_space<vmem>>, vector<1x1x512xf32>
    %198 = vector.shape_cast %197 : vector<1x1x512xf32> to vector<1x512xf32>
    %199 = vector.broadcast %198 : vector<1x512xf32> to vector<8x512xf32>
    %200 = arith.mulf %196, %199 : vector<8x512xf32>
    %c192 = arith.constant 192 : index
    %c0_84 = arith.constant 0 : index
    %201 = vector.load %arg10[%c192, %c0_84] : memref<216x512xf32, #tpu.memory_space<vmem>>, vector<8x512xf32>
    tpu.vector_store %arg10[%c192, %c0_84], %200 {strides = array<i32>} : memref<216x512xf32, #tpu.memory_space<vmem>>, vector<8x512xf32>,
    %202 = vector.extract_strided_slice %8 {offsets = [0, 72], sizes = [8, 440], strides = [1, 1]} : vector<8x512xf32> to vector<8x440xf32>
    %203 = vector.extract_strided_slice %8 {offsets = [0, 0], sizes = [8, 72], strides = [1, 1]} : vector<8x512xf32> to vector<8x72xf32>
    %204 = tpu.concatenate %202, %203 in 1 : vector<8x440xf32>, vector<8x72xf32> -> vector<8x512xf32>
    %c25 = arith.constant 25 : index
    %c0_85 = arith.constant 0 : index
    %c0_86 = arith.constant 0 : index
    %205 = vector.load %arg8[%c25, %c0_85, %c0_86] : memref<27x1x512xf32, #tpu.memory_space<vmem>>, vector<1x1x512xf32>
    %206 = vector.shape_cast %205 : vector<1x1x512xf32> to vector<1x512xf32>
    %207 = vector.broadcast %206 : vector<1x512xf32> to vector<8x512xf32>
    %208 = arith.mulf %204, %207 : vector<8x512xf32>
    %c200 = arith.constant 200 : index
    %c0_87 = arith.constant 0 : index
    %209 = vector.load %arg10[%c200, %c0_87] : memref<216x512xf32, #tpu.memory_space<vmem>>, vector<8x512xf32>
    tpu.vector_store %arg10[%c200, %c0_87], %208 {strides = array<i32>} : memref<216x512xf32, #tpu.memory_space<vmem>>, vector<8x512xf32>,
    %210 = vector.extract_strided_slice %8 {offsets = [0, 73], sizes = [8, 439], strides = [1, 1]} : vector<8x512xf32> to vector<8x439xf32>
    %211 = vector.extract_strided_slice %8 {offsets = [0, 0], sizes = [8, 73], strides = [1, 1]} : vector<8x512xf32> to vector<8x73xf32>
    %212 = tpu.concatenate %210, %211 in 1 : vector<8x439xf32>, vector<8x73xf32> -> vector<8x512xf32>
    %c26 = arith.constant 26 : index
    %c0_88 = arith.constant 0 : index
    %c0_89 = arith.constant 0 : index
    %213 = vector.load %arg8[%c26, %c0_88, %c0_89] : memref<27x1x512xf32, #tpu.memory_space<vmem>>, vector<1x1x512xf32>
    %214 = vector.shape_cast %213 : vector<1x1x512xf32> to vector<1x512xf32>
    %215 = vector.broadcast %214 : vector<1x512xf32> to vector<8x512xf32>
    %216 = arith.mulf %212, %215 : vector<8x512xf32>
    %c208 = arith.constant 208 : index
    %c0_90 = arith.constant 0 : index
    %217 = vector.load %arg10[%c208, %c0_90] : memref<216x512xf32, #tpu.memory_space<vmem>>, vector<8x512xf32>
    tpu.vector_store %arg10[%c208, %c0_90], %216 {strides = array<i32>} : memref<216x512xf32, #tpu.memory_space<vmem>>, vector<8x512xf32>,
    %c0_91 = arith.constant 0 : index
    %c0_92 = arith.constant 0 : index
    %218 = vector.load %arg4[%c0_91, %c0_92] : memref<8x216xf32, #tpu.memory_space<vmem>>, vector<8x216xf32>
    %c0_93 = arith.constant 0 : index
    %c0_94 = arith.constant 0 : index
    %219 = vector.load %arg10[%c0_93, %c0_94] : memref<216x512xf32, #tpu.memory_space<vmem>>, vector<216x512xf32>
    %cst_95 = arith.constant dense<0.000000e+00> : vector<8x512xf32>
    %220 = tpu.matmul %218, %219, %cst_95 {dimension_numbers = #tpu.dot_dimension_numbers<[1], [0], [0], [1], [0, 0, 1, 1], [], []>} : vector<8x216xf32>, vector<216x512xf32>, vector<8x512xf32> -> vector<8x512xf32>
    %c0_96 = arith.constant 0 : index
    %c0_97 = arith.constant 0 : index
    %221 = vector.load %arg5[%c0_96, %c0_97] : memref<8x1xf32, #tpu.memory_space<vmem>>, vector<8x1xf32>
    %222 = vector.broadcast %221 : vector<8x1xf32> to vector<8x512xf32>
    %223 = arith.addf %220, %222 : vector<8x512xf32>
    %cst_98 = arith.constant 0.000000e+00 : f32
    %224 = vector.broadcast %cst_98 : f32 to vector<8x512xf32>
    %225 = arith.maximumf %223, %224 : vector<8x512xf32>
    %c0_99 = arith.constant 0 : index
    %c0_100 = arith.constant 0 : index
    %226 = vector.load %arg6[%c0_99, %c0_100] : memref<32x8xf32, #tpu.memory_space<vmem>>, vector<32x8xf32>
    %cst_101 = arith.constant dense<0.000000e+00> : vector<32x512xf32>
    %227 = tpu.matmul %226, %225, %cst_101 {dimension_numbers = #tpu.dot_dimension_numbers<[1], [0], [0], [1], [0, 0, 1, 1], [], []>} : vector<32x8xf32>, vector<8x512xf32>, vector<32x512xf32> -> vector<32x512xf32>
    %c0_102 = arith.constant 0 : index
    %c0_103 = arith.constant 0 : index
    %228 = vector.load %arg7[%c0_102, %c0_103] : memref<32x1xf32, #tpu.memory_space<vmem>>, vector<32x1xf32>
    %229 = vector.broadcast %228 : vector<32x1xf32> to vector<32x512xf32>
    %230 = arith.addf %227, %229 : vector<32x512xf32>
    %231 = arith.addf %230, %1 : vector<32x512xf32>
    %cst_104 = arith.constant 0.000000e+00 : f32
    %232 = vector.broadcast %cst_104 : f32 to vector<32x512xf32>
    %233 = arith.maximumf %231, %232 : vector<32x512xf32>
    %c0_105 = arith.constant 0 : index
    %c0_106 = arith.constant 0 : index
    %c0_107 = arith.constant 0 : index
    %234 = vector.load %arg9[%c0_105, %c0_106, %c0_107] : memref<1x32x512xf32, #tpu.memory_space<vmem>>, vector<1x32x512xf32>
    %235 = vector.shape_cast %234 : vector<1x32x512xf32> to vector<32x512xf32>
    %236 = vector.shape_cast %233 : vector<32x512xf32> to vector<1x32x512xf32>
    tpu.vector_store %arg9[%c0_105, %c0_106, %c0_107], %236 {strides = array<i32>} : memref<1x32x512xf32, #tpu.memory_space<vmem>>, vector<1x32x512xf32>,
    return
  }
  func.func @transform_0(%arg0: i32) -> (i32, i32, i32) {
    %c0_i32 = arith.constant 0 : i32
    %c0_i32_0 = arith.constant 0 : i32
    %c0_i32_1 = arith.constant 0 : i32
    return %arg0, %c0_i32, %c0_i32_0 : i32, i32, i32
  }
  func.func @transform_1(%arg0: i32) -> (i32, i32) {
    %c0_i32 = arith.constant 0 : i32
    %c0_i32_0 = arith.constant 0 : i32
    %c0_i32_1 = arith.constant 0 : i32
    return %c0_i32, %c0_i32_0 : i32, i32
  }
  func.func @transform_2(%arg0: i32) -> (i32, i32) {
    %c0_i32 = arith.constant 0 : i32
    %c0_i32_0 = arith.constant 0 : i32
    %c0_i32_1 = arith.constant 0 : i32
    return %c0_i32, %c0_i32_0 : i32, i32
  }
  func.func @transform_3(%arg0: i32) -> (i32, i32) {
    %c0_i32 = arith.constant 0 : i32
    %c0_i32_0 = arith.constant 0 : i32
    %c0_i32_1 = arith.constant 0 : i32
    return %c0_i32, %c0_i32_0 : i32, i32
  }
  func.func @transform_4(%arg0: i32) -> (i32, i32) {
    %c0_i32 = arith.constant 0 : i32
    %c0_i32_0 = arith.constant 0 : i32
    %c0_i32_1 = arith.constant 0 : i32
    return %c0_i32, %c0_i32_0 : i32, i32
  }
  func.func @transform_5(%arg0: i32) -> (i32, i32) {
    %c0_i32 = arith.constant 0 : i32
    %c0_i32_0 = arith.constant 0 : i32
    %c0_i32_1 = arith.constant 0 : i32
    return %c0_i32, %c0_i32_0 : i32, i32
  }
  func.func @transform_6(%arg0: i32) -> (i32, i32) {
    %c0_i32 = arith.constant 0 : i32
    %c0_i32_0 = arith.constant 0 : i32
    %c0_i32_1 = arith.constant 0 : i32
    return %c0_i32, %c0_i32_0 : i32, i32
  }
  func.func @transform_7(%arg0: i32) -> (i32, i32, i32) {
    %c0_i32 = arith.constant 0 : i32
    %c0_i32_0 = arith.constant 0 : i32
    %c0_i32_1 = arith.constant 0 : i32
    %c0_i32_2 = arith.constant 0 : i32
    return %c0_i32, %c0_i32_0, %c0_i32_1 : i32, i32, i32
  }
  func.func @transform_8(%arg0: i32) -> (i32, i32, i32) {
    %c0_i32 = arith.constant 0 : i32
    %c0_i32_0 = arith.constant 0 : i32
    %c0_i32_1 = arith.constant 0 : i32
    return %arg0, %c0_i32, %c0_i32_0 : i32, i32, i32
  }
}

</mosaic_0001>

<bundles_post_ra>
// kernel: tpu_custom_call.1
= control target key start
LH: loop header
LB: loop body
LE: loop exit
PB: predicated region body
PF: predicated region fallthrough
CT: control target
= control target key end

     0   :  { %13 = vsyncpa [#allocation4], 0  ;;  %s4088_s0 = inlined_call_operand.hbm [shape: f32[2,32,512], index: 0, kind: input, shape index: {}]   ;;  %s4089_s1 = inlined_call_operand.vmem [shape: f32[8,32], index: 1, kind: input, shape index: {}]   ;;  %s4090_s2 = inlined_call_operand.vmem [shape: f32[8,1], index: 2, kind: input, shape index: {}]   ;;  %s4091_s3 = inlined_call_operand.hbm [shape: f32[8,216], index: 3, kind: input, shape index: {}]   ;;  %s4092_s4 = inlined_call_operand.vmem [shape: f32[8,1], index: 4, kind: input, shape index: {}]   ;;  %s4093_s5 = inlined_call_operand.vmem [shape: f32[32,8], index: 5, kind: input, shape index: {}]   ;;  %s4094_s6 = inlined_call_operand.vmem [shape: f32[32,1], index: 6, kind: input, shape index: {}]   ;;  %s4095_s7 = inlined_call_operand.vmem [shape: f32[27,1,512], index: 7, kind: input, shape index: {}]   ;;  %s4096_s8 = inlined_call_operand.hbm [shape: f32[2,32,512], index: 8, kind: output, shape index: {}]  }
   0x1   :  { %15 = vsyncpa [#allocation4 + $0x1], 0 }
   0x2   :  { %16 = vsyncpa [#allocation7], 0 }
   0x3   :  { %17 = vsyncpa [#allocation5], 0 }
   0x4   :  { %19 = vsyncpa [#allocation5 + $0x1], 0  ;;  %s2732_s27 = smov 0   ;;  %s2734_s28 = smov 0  }
   0x5   :  { %s2736_s29 = smov 0   ;;  %s2738_s30 = smov 0  }
   0x6 LB: > { %4153 = sst [smem:[#allocation12_spill]] %s2655_s29  ;;  %s2753_s9 = sadd.s32 4294967295, %s2659_s30   ;;  %s2659_s30 = sphi %s2738_s30, %s4321_s30   ;;  %s2655_s29 = sphi %s2736_s29, %s4326_s29   ;;  %s2651_s28 = sphi %s2734_s28, %s4325_s28   ;;  %s2647_s27 = sphi %s2732_s27, %s4324_s27  }
   0x7   : > { %s2258_s10 = sadd.s32 4294967294, %s2659_s30   ;;  %s2757_s11 = sadd.s32 1, %s2659_s30  }
   0x8   : > { %4154 = sst [smem:[#allocation13_spill]] %s2757_s11  ;;  %s32_s12 = sadd.s32 1, %s2655_s29 }
   0x9   : > { %s29_s13 = ssub.s32 %s2659_s30, %s2757_s11  ;;  %p39_p0 = scmp.ne.s32.totalorder %s2655_s29, %s2651_s28 }
   0xa   : > { %p30_p1 = scmp.eq.s32.totalorder %s29_s13, 0  ;;  %p40_p2 = scmp.eq.s32.totalorder %s2659_s30, 0 }
   0xb   : > { %p45_p3 = scmp.ne.s32.totalorder %s2651_s28, %s2647_s27  ;;  %p4097_p4 = scmp.eq.s32.totalorder %s2753_s9, 0 }
   0xc   : > { %s2769_s14 = scalar_select %p30_p1, %s2655_s29, %s32_s12  }
   0xd   : > { %p2771_p5 = por %p40_p2, %p39_p0  ;;  %p2777_p6 = por %p4097_p4, %p45_p3 }
   0xe   : > { %4155 = sst [smem:[#allocation14_spill]] %s2769_s14  ;;  %p216_p7 = scmp.eq.s32.totalorder %s2753_s9, 1 }
   0xf   : > { %s4157_s16 = scalar_select %p2777_p6, 1, 0 }
  0x10   : > { %p222_p8 = scmp.eq.s32.totalorder %s2258_s10, 1  ;;  %p2259_p9 = scmp.ge.s32.totalorder %s2659_s30, 1 }
  0x11   : > { %p229_p10 = scmp.lt.s32.totalorder %s2659_s30, 3  ;;  %p2784_p11 = por %p216_p7, %p39_p0 }
  0x12   : > { %p2788_p12 = por %p222_p8, %p45_p3  ;;  %s2661_s20 = smov [#allocation6]  }
  0x13   : > { %s4158_s17 = scalar_select %p2784_p11, 1, 0 }
  0x14   : > { %s4159_s18 = scalar_select %p2788_p12, 1, 0 }
  0x15   : > { %p2792_p13 = pnand %p2259_p9, %p229_p10  ;;  %s248_s21 = sshll.u32 %s2661_s20, 4  ;;  %s249_s21 = int_to_ptr.vmem [resolvable:$true] %s248_s21 }
  0x16   : > { %p2454_p4 = scmp.lt.s32.totalorder %s2659_s30, 2  ;;  %p4161_p0 = scmp.eq.s32.totalorder %s2753_s9, 0 }
  0x17   : > { %s4160_s19 = scalar_select %p2792_p13, 1, 0 }
  0x18   : > { %p2441_p2 = pneg %p2792_p13  ;;  %s271_s23 = sand.u32 1, %s2655_s29  }
  0x19   : > { %p2809_p3 = pnand %p2454_p4, %p2771_p5  ;;  %s2262_s25 = sshll.u32 %s271_s23, 7 }
  0x1a   : > { %p2802_p7 = pnand %p2441_p2, %p4161_p0  ;;  %s2531_s12 = scalar_lea.hbm %s4091_s3, 256 }
  0x1b   : > { %s4163_s24 = scalar_select %p2809_p3, 1, 0 }
  0x1c   : > { %p2532_p8 = scmp.ne.s32.totalorder %s4091_s3, %s2531_s12  ;;  %p2533_p9 = pneg %p2802_p7 }
  0x1d   : > { %p2538_p4 = scmp.lt.u32.totalorder %s2531_s12, %s4091_s3 }
  0x1e   : > { %p2534_p10 = pnand %p2533_p9, %p2532_p8 }
  0x20   : > { %p2535_p2 = pneg %p2534_p10 }
  0x22   : > { %p2540_p5 = pnand %p2538_p4, %p2535_p2 }
  0x24   : > { %2543 = shalt.err (!%p2540_p5)
}
  0x25   : > { %s2544_s15 = scalar_lea.vmem %s249_s21, 256  ;;  %p2552_p11 = scmp.lt.s32.totalorder %s249_s21, %s249_s21 }
  0x26   : > { %p2545_p0 = scmp.ne.s32.totalorder %s249_s21, %s2544_s15  ;;  %p2553_p6 = scmp.lt.s32.totalorder %s2544_s15, %s2544_s15 }
  0x28   : > { %p2547_p1 = pnand %p2545_p0, %p2533_p9  ;;  %p2554_p13 = por %p2553_p6, %p2552_p11 }
  0x2a   : > { %p2548_p12 = pneg %p2547_p1 }
  0x2c   : > { %p2555_p3 = pnand %p2554_p13, %p2548_p12 }
  0x2e   : > { %2558 = shalt.err (!%p2555_p3)
}
  0x2f   : > { %2444 = dma.hbm_to_vmem [thread:$0]  (!%p2802_p7), %s4091_s3, 256, %s249_s21, [#allocation7]  }
  0x30   : > { %s2311_s29 = sshll.u32 %s2659_s30, 11  ;;  %s275_s14 = scalar_lea.vmem [#allocation3], %s2262_s25 }
  0x31   : > { %s282_s12 = sshll.u32 %s275_s14, 4  ;;  %s2833_s11 = scalar_lea.hbm %s4088_s0, %s2311_s29  ;;  %s2835_s12 = int_to_ptr.vmem [resolvable:$true] %s282_s12 }
  0x32   : > { %s2837_s22 = scalar_lea.sflag [#allocation4], %s271_s23  ;;  %s2559_s15 = scalar_lea.hbm %s2833_s11, 2048 }
  0x33   : > { %p2560_p6 = scmp.ne.s32.totalorder %s2833_s11, %s2559_s15  ;;  %p4164_p11 = scmp.ne.s32.totalorder %s4163_s24, 0 }
  0x34   : > { %s2564_s26 = scalar_lea.hbm %s4088_s0, 4096  ;;  %p2565_p7 = scmp.lt.u32.totalorder %s2833_s11, %s4088_s0 }
  0x35   : > { %p2561_p12 = pneg %p4164_p11  ;;  %p2566_p3 = scmp.lt.u32.totalorder %s2564_s26, %s2559_s15 }
  0x36   : > { %p2568_p9 = scmp.lt.u32.totalorder %s2559_s15, %s2833_s11 }
  0x37   : > { %p2562_p13 = pnand %p2561_p12, %p2560_p6  ;;  %p2567_p8 = por %p2566_p3, %p2565_p7 }
  0x39   : > { %p2563_p1 = pneg %p2562_p13  ;;  %p2569_p10 = por %p2568_p9, %p2567_p8 }
  0x3b   : > { %p2570_p2 = pnand %p2569_p10, %p2563_p1 }
  0x3d   : > { %2573 = shalt.err (!%p2570_p2)
}
  0x3e   : > { %s2574_s23 = scalar_lea.vmem %s2835_s12, 2048  ;;  %s2662_s14 = smov [#allocation3]  }
  0x3f   : > { %p2575_p4 = scmp.ne.s32.totalorder %s2835_s12, %s2574_s23  ;;  %s2579_s13 = sshll.u32 %s2662_s14, 4  ;;  %s2580_s13 = int_to_ptr.vmem [resolvable:$false] %s2579_s13 }
  0x40   : > { %s2581_s20 = scalar_lea.vmem %s2580_s13, 4096  ;;  %p2582_p6 = scmp.lt.s32.totalorder %s2835_s12, %s2580_s13 }
  0x41   : > { %p2577_p5 = pnand %p2575_p4, %p2561_p12  ;;  %p2583_p13 = scmp.lt.s32.totalorder %s2581_s20, %s2574_s23 }
  0x43   : > { %p2578_p0 = pneg %p2577_p5  ;;  %p2584_p7 = por %p2583_p13, %p2582_p6 }
  0x45   : > { %p2585_p3 = pnand %p2584_p7, %p2578_p0 }
  0x47   : > { %2588 = shalt.err (!%p2585_p3)
}
  0x48   : > { %s2663_s15 = smov 512   ;;  %s2664_s21 = smov 32  }
  0x49   : > { %2448 = dma.hbm_to_vmem [thread:$0]  (!%p4164_p11), %s2833_s11, 2048, %s2835_s12, %s2837_s22, %s2663_s15, %s2663_s15, %s2664_s21  }
  0x4a   : > { %p4165_p12 = scmp.ne.s32.totalorder %s4160_s19, 0 }
  0x4c   : > { %294 = sbr.rel (%p4165_p12) target bundleno = 1066 (0x42a), region = 52 }
  0x53   : > { %s2868_s25 = sand.u32 1, %s2651_s28   ;;  %p4166_p1 = scmp.ne.s32.totalorder %s4157_s16, 0 }
  0x54   : > { %s2266_s26 = sshll.u32 %s2868_s25, 7  ;;  %s297_s10 = scalar_lea.sflag [#allocation4], %s2868_s25 }
  0x55   : > { %s2874_s29 = scalar_lea.vmem [#allocation3], %s2266_s26 }
  0x56   : > { %2634 = dma.done.wait (%p4166_p1), %s297_s10, 2048  }
  0x57   : > { %2636 = vsyncadd (%p4166_p1), %s297_s10, 4294965248  ;;  %p4167_p11 = scmp.eq.s32.totalorder %s2753_s9, 0 }
  0x59   : > { %2638 = dma.done.wait (%p4167_p11), [#allocation7], 256   ;;  %p4168_p8 = pmov %p4167_p11 }
  0x5a   : > { %v4105_v0 = vmov 0.0   ;;  %v2666_v1 = vmov 0   ;;  %v338_v2 = vld [vmem:[%s2874_s29 + $0x8] sm:$0xff]  ;;  %v340_v4 = vld [vmem:[%s2874_s29 + $0x18] sm:$0xff]  ;;  %v337_v7 = vld [vmem:[%s2874_s29] sm:$0xff]  ;;  %vm360_vm0 = vcmask 261120   ;;  %v534_v37 = vlaneseq }
  0x5b   : > { %2640 = vsyncadd (%p4168_p8), [#allocation7], 4294967040  ;;  %428 = vmatprep.mubr.f32.mxu0 %v4105_v0  ;;  %499 = vmatprep.mubr.f32.mxu1 %v4105_v0  ;;  %v342_v3 = vld [vmem:[%s2874_s29 + $0x28] sm:$0xff]  ;;  %v344_v6 = vld [vmem:[%s2874_s29 + $0x38] sm:$0xff]  ;;  %s2667_s12 = smov 73   ;;  %s2668_s22 = smov 127  }
  0x5c   : > { %2513 = vset.pattern.permute.xlu0 %v2666_v1  ;;  %2514 = vset.pattern.permute.xlu1 %v2666_v1  ;;  %v2313_v5 = vpack.c.bf16 %v342_v3, %v338_v2  ;;  %v341_v8 = vld [vmem:[%s2874_s29 + $0x20] sm:$0xff]  ;;  %v2321_v9 = vpack.c.bf16 %v344_v6, %v340_v4  ;;  %v339_v11 = vld [vmem:[%s2874_s29 + $0x10] sm:$0xff]  ;;  %v346_v13 = vld [vmem:[%s2874_s29 + $0x48] sm:$0xff]  ;;  %s2669_s23 = smov 72   ;;  %s2670_s14 = smov 121   ;;  %v2928_v38 = vshrl.u32 %v534_v37, 7 }
  0x5d   : > { %v2315_v10 = vpack.c.bf16 %v341_v8, %v337_v7  ;;  %v343_v12 = vld [vmem:[%s2874_s29 + $0x30] sm:$0xff]  ;;  %v350_v15 = vld [vmem:[%s2874_s29 + $0x68] sm:$0xff]  ;;  %v348_v16 = vld [vmem:[%s2874_s29 + $0x58] sm:$0xff]  ;;  %s2671_s13 = smov 71   ;;  %s2672_s21 = smov 120   ;;  %vm523_vm1 = vcmask 596992  }
  0x5e   : > { %2314 = vmatprep.subr.bf16.mxu0 %v2313_v5  ;;  %v2323_v14 = vpack.c.bf16 %v343_v12, %v339_v11  ;;  %v352_v17 = vld [vmem:[%s2874_s29 + $0x78] sm:$0xff]  ;;  %2322 = vmatprep.subr.bf16.mxu1 %v2321_v9  ;;  %v2317_v18 = vpack.c.bf16 %v350_v15, %v346_v13  ;;  %v345_v20 = vld [vmem:[%s2874_s29 + $0x40] sm:$0xff]  ;;  %v347_v22 = vld [vmem:[%s2874_s29 + $0x50] sm:$0xff]  ;;  %v2935_v39 = vsub.s32 0, %v2928_v38  ;;  %v2938_v40 = vsub.s32 3, %v2928_v38  ;;  %s2673_s10 = smov 65  }
  0x5f   : > { %2316 = vmatpush1.bf16.msra.mxu0 %v2315_v10  ;;  %v2325_v19 = vpack.c.bf16 %v352_v17, %v348_v16  ;;  %v349_v21 = vld [vmem:[%s2874_s29 + $0x60] sm:$0xff]  ;;  %v351_v24 = vld [vmem:[%s2874_s29 + $0x70] sm:$0xff]  ;;  %v2953_v44 = vsub.s32 2, %v2928_v38  ;;  %s2674_s11 = smov 64   ;;  %s2675_s16 = smov 63   ;;  %v3082_v8 = vsub.s32 1, %v2928_v38 }
  0x60   : > { %2324 = vmatpush1.bf16.msra.mxu1 %v2323_v14  ;;  %v2319_v23 = vpack.c.bf16 %v349_v21, %v345_v20  ;;  %v354_v25 = vld [vmem:[%s4090_s2] sm:$0xff]  ;;  %2318 = vmatprep.subr.bf16.mxu0 %v2317_v18  ;;  %v2327_v26 = vpack.c.bf16 %v351_v24, %v347_v22  ;;  %s2676_s19 = smov 57   ;;  %s2677_s24 = smov 56   ;;  %v3065_v1 = vld [vmem:[%s4095_s7 + $0x48] sm:$0xf]  ;;  %v1901_v3 = vld [vmem:[%s4094_s6 + $0x10] sm:$0xff] }
  0x61   : > { %2326 = vmatprep.subr.bf16.mxu1 %v2325_v19  ;;  %357 = vperm.xlu0 %2513, %v354_v25   ;;  %v353_v27 = vld [vmem:[%s4089_s1] sm:$0xff]  ;;  %s2680_s20 = smov 8   ;;  %s2681_s15 = smov 7   ;;  %v1356_v6 = vrot.slane %v3065_v1, %v2935_v39  ;;  %v2288_v7 = vld [vmem:[%s4095_s7 + $0x4c] sm:$0xf]  ;;  %vm571_vm2 = vcmask 588800   ;;  %v1360_v19 = vrot.slane %v3065_v1, %v3082_v8 }
  0x62   : > { %v2943_v41 = vld [vmem:[%s4095_s7 + $0x4] sm:$0xf]  ;;  %v3060_v63 = vld [vmem:[%s4095_s7] sm:$0xf]  ;;  %v1395_v15 = vrot.slane %v2288_v7, %v2953_v44  ;;  %v1399_v16 = vrot.slane %v2288_v7, %v2938_v40  ;;  %v1630_v17 = vld [vmem:[#allocation6 + $0x8] sm:$0xff]  ;;  %vm1745_vm3 = vcmask 719872   ;;  %v1387_v25 = vrot.slane %v2288_v7, %v2935_v39 }
  0x63   : > { %2320 = vmatpush1.bf16.msra.mxu0 %v2319_v23  ;;  %v586_v42 = vrot.slane %v2943_v41, %v2935_v39  ;;  %v598_v43 = vrot.slane %v2943_v41, %v2938_v40  ;;  %v594_v46 = vrot.slane %v2943_v41, %v2953_v44  ;;  %v1899_v61 = vld [vmem:[%s4094_s6] sm:$0xff]  ;;  %v545_v5 = vrot.slane %v3060_v63, %v2953_v44  ;;  %p4318_p10 = scmp.ne.s32.totalorder %s4158_s17, 0 }
  0x64   : > { %2328 = vmatpush1.bf16.msra.mxu1 %v2327_v26  ;;  %v541_v18 = vrot.slane %v3060_v63, %v3082_v8  ;;  %v590_v21 = vrot.slane %v2943_v41, %v3082_v8  ;;  %v1391_v26 = vrot.slane %v2288_v7, %v3082_v8  ;;  %vm620_vm4 = vcmask 580608  }
  0x65   : > { %vm669_vm5 = vcmask 531456   ;;  %vm718_vm6 = vcmask 523264   ;;  %vm767_vm7 = vcmask 515072   ;;  %vm816_vm8 = vcmask 465920  }
  0x66   : > { %2269 = vmatmul.mubr.msk.f32.vlgmr.msra.gmra.mrb[0].mxu0 %vm360_vm0, %v353_v27  ;;  %vm865_vm9 = vcmask 457728   ;;  %vm914_vm10 = vcmask 449536   ;;  %vm963_vm11 = vcmask 72704   ;;  %vm1012_vm12 = vcmask 64512  }
  0x67   : > { %2270 = vmatmul.mubr.msk.f32.vlgmr.msra.gmra.mrb[0].mxu1 %vm360_vm0, %v353_v27  ;;  %2296 = vmatprep.mubr.msk.f32.mxu0 %vm1745_vm3, %v1630_v17  ;;  %v3113_v27 = vld [vmem:[%s4095_s7 + $0x8] sm:$0xf]  ;;  %vm1162_vm13 = vcmask 1039360   ;;  %vm1061_vm14 = vcmask 56320   ;;  %vm1211_vm15 = vcmask 990208   ;;  %vm1110_vm0 = vcmask 7168  }
  0x68   : > { %2297 = vmatprep.mubr.msk.f32.mxu1 %vm1745_vm3, %v1630_v17  ;;  %v635_v37 = vrot.slane %v3113_v27, %v2935_v39  ;;  %v647_v38 = vrot.slane %v3113_v27, %v2938_v40 }
  0xe0   : > { %v358_v28 = vpop.permute.xlu0 %357 }
 0x139   : > { %v430_v29 = vpop.f32.mrb[0].mxu0 }
 0x13a   : > { %v431_v30 = vadd.f32 %v430_v29, %v358_v28  ;;  %v501_v31 = vpop.f32.mrb[0].mxu1  ;;  %v432_v32 = vpop.f32.mrb[1].mxu0 }
 0x13b   : > { %v502_v33 = vadd.f32 %v501_v31, %v358_v28  ;;  %v503_v34 = vpop.f32.mrb[1].mxu1  ;;  %v433_v45 = vadd.f32 %v432_v32, %v358_v28 }
 0x13c   : > { %v2908_v35 = vmax.f32 %v431_v30, 0.0  ;;  %v504_v48 = vadd.f32 %v503_v34, %v358_v28  ;;  %v3118_v28 = vld [vmem:[%s4095_s7 + $0x50] sm:$0xf] }
 0x13d   : > { %v2910_v36 = vmax.f32 %v502_v33, 0.0  ;;  %v2960_v47 = vmax.f32 %v433_v45, 0.0  ;;  %v1739_v33 = vld [vmem:[%s4092_s4] sm:$0xff] }
 0x13e   : > { %4169 = vst [vmem:[#allocation15_spill] sm:$0xff] %v2908_v35  ;;  %517 = vrot.lane.b32.xlu1 %v2908_v35, %s2667_s12  ;;  %v2965_v49 = vmax.f32 %v504_v48, 0.0 }
 0x13f   : > { %4170 = vst [vmem:[#allocation16_spill] sm:$0xff] %v2910_v36  ;;  %521 = vrot.lane.b32.xlu0 %v2910_v36, %s2667_s12  ;;  %4171 = vst [vmem:[#allocation17_spill] sm:$0xff] %v2960_v47 }
 0x140   : > { %4172 = vst [vmem:[#allocation18_spill] sm:$0xff] %v2965_v49 }
 0x142   : > { %1154 = vrot.lane.b32.xlu1 %v2908_v35, %s2668_s22 }
 0x143   : > { %565 = vrot.lane.b32.xlu0 %v2908_v35, %s2669_s23 }
 0x146   : > { %1158 = vrot.lane.b32.xlu1 %v2910_v36, %s2668_s22 }
 0x147   : > { %569 = vrot.lane.b32.xlu0 %v2910_v36, %s2669_s23 }
 0x14a   : > { %1203 = vrot.lane.b32.xlu1 %v2908_v35, %s2670_s14 }
 0x14b   : > { %614 = vrot.lane.b32.xlu0 %v2908_v35, %s2671_s13 }
 0x14e   : > { %1207 = vrot.lane.b32.xlu1 %v2910_v36, %s2670_s14 }
 0x14f   : > { %618 = vrot.lane.b32.xlu0 %v2910_v36, %s2671_s13 }
 0x152   : > { %1252 = vrot.lane.b32.xlu1 %v2908_v35, %s2672_s21 }
 0x153   : > { %663 = vrot.lane.b32.xlu0 %v2908_v35, %s2673_s10 }
 0x156   : > { %1256 = vrot.lane.b32.xlu1 %v2910_v36, %s2672_s21 }
 0x157   : > { %667 = vrot.lane.b32.xlu0 %v2910_v36, %s2673_s10 }
 0x15a   : > { %519 = vrot.lane.b32.xlu1 %v2960_v47, %s2667_s12 }
 0x15b   : > { %712 = vrot.lane.b32.xlu0 %v2908_v35, %s2674_s11 }
 0x15e   : > { %562 = vrot.lane.b32.xlu1 %v2965_v49, %s2669_s23 }
 0x15f   : > { %716 = vrot.lane.b32.xlu0 %v2910_v36, %s2674_s11 }
 0x162   : > { %567 = vrot.lane.b32.xlu1 %v2960_v47, %s2669_s23  ;;  %s2678_s23 = smov 55  }
 0x163   : > { %761 = vrot.lane.b32.xlu0 %v2908_v35, %s2675_s16 }
 0x166   : > { %611 = vrot.lane.b32.xlu1 %v2965_v49, %s2671_s13 }
 0x167   : > { %765 = vrot.lane.b32.xlu0 %v2910_v36, %s2675_s16 }
 0x16a   : > { %616 = vrot.lane.b32.xlu1 %v2960_v47, %s2671_s13  ;;  %s2679_s13 = smov 9  }
 0x16b   : > { %810 = vrot.lane.b32.xlu0 %v2908_v35, %s2676_s19 }
 0x16e   : > { %660 = vrot.lane.b32.xlu1 %v2965_v49, %s2673_s10 }
 0x16f   : > { %814 = vrot.lane.b32.xlu0 %v2910_v36, %s2676_s19 }
 0x172   : > { %665 = vrot.lane.b32.xlu1 %v2960_v47, %s2673_s10  ;;  %s2682_s10 = smov 1  }
 0x173   : > { %859 = vrot.lane.b32.xlu0 %v2908_v35, %s2677_s24 }
 0x176   : > { %709 = vrot.lane.b32.xlu1 %v2965_v49, %s2674_s11 }
 0x177   : > { %863 = vrot.lane.b32.xlu0 %v2910_v36, %s2677_s24 }
 0x17a   : > { %714 = vrot.lane.b32.xlu1 %v2960_v47, %s2674_s11  ;;  %s4006_s11 = scalar_lea.vmem [#allocation8], %s2266_s26  ;;  %s2312_s26 = sshll.u32 %s2753_s9, 11 }
 0x17b   : > { %908 = vrot.lane.b32.xlu0 %v2908_v35, %s2678_s23  ;;  %s2162_s9 = scalar_lea.sflag [#allocation5], %s2868_s25 }
 0x17e   : > { %758 = vrot.lane.b32.xlu1 %v2965_v49, %s2675_s16 }
 0x17f   : > { %912 = vrot.lane.b32.xlu0 %v2910_v36, %s2678_s23 }
 0x182   : > { %763 = vrot.lane.b32.xlu1 %v2960_v47, %s2675_s16  ;;  %s2175_s16 = sshll.u32 %s4006_s11, 4  ;;  %s4042_s16 = int_to_ptr.vmem [resolvable:$true] %s2175_s16 }
 0x183   : > { %957 = vrot.lane.b32.xlu0 %v2908_v35, %s2679_s13 }
 0x186   : > { %807 = vrot.lane.b32.xlu1 %v2965_v49, %s2676_s19 }
 0x187   : > { %961 = vrot.lane.b32.xlu0 %v2910_v36, %s2679_s13 }
 0x18a   : > { %812 = vrot.lane.b32.xlu1 %v2960_v47, %s2676_s19 }
 0x18b   : > { %1006 = vrot.lane.b32.xlu0 %v2908_v35, %s2680_s20 }
 0x18e   : > { %856 = vrot.lane.b32.xlu1 %v2965_v49, %s2677_s24 }
 0x18f   : > { %1010 = vrot.lane.b32.xlu0 %v2910_v36, %s2680_s20 }
 0x192   : > { %861 = vrot.lane.b32.xlu1 %v2960_v47, %s2677_s24 }
 0x193   : > { %1055 = vrot.lane.b32.xlu0 %v2908_v35, %s2681_s15 }
 0x196   : > { %905 = vrot.lane.b32.xlu1 %v2965_v49, %s2678_s23 }
 0x197   : > { %1059 = vrot.lane.b32.xlu0 %v2910_v36, %s2681_s15 }
 0x19a   : > { %910 = vrot.lane.b32.xlu1 %v2960_v47, %s2678_s23  ;;  %s4040_s23 = scalar_lea.hbm %s4096_s8, %s2312_s26 }
 0x19b   : > { %1104 = vrot.lane.b32.xlu0 %v2908_v35, %s2682_s10 }
 0x19e   : > { %954 = vrot.lane.b32.xlu1 %v2965_v49, %s2679_s13 }
 0x19f   : > { %1108 = vrot.lane.b32.xlu0 %v2910_v36, %s2682_s10 }
 0x1a2   : > { %959 = vrot.lane.b32.xlu1 %v2960_v47, %s2679_s13  ;;  %s2589_s13 = scalar_lea.vmem %s4042_s16, 2048 }
 0x1a3   : > { %511 = vrot.lane.b32.xlu0 %v2965_v49, %s2667_s12  ;;  %s2683_s12 = smov 119   ;;  %p2590_p9 = scmp.ne.s32.totalorder %s4042_s16, %s2589_s13 }
 0x1a5   : > { %p2591_p2 = pnand %p2590_p9, %p4318_p10 }
 0x1a6   : > { %1003 = vrot.lane.b32.xlu1 %v2965_v49, %s2680_s20 }
 0x1a7   : > { %1156 = vrot.lane.b32.xlu0 %v2960_v47, %s2668_s22  ;;  %p2592_p4 = pneg %p2591_p2 }
 0x1aa   : > { %1008 = vrot.lane.b32.xlu1 %v2960_v47, %s2680_s20 }
 0x1ab   : > { %1160 = vrot.lane.b32.xlu0 %v2965_v49, %s2668_s22 }
 0x1ae   : > { %1052 = vrot.lane.b32.xlu1 %v2965_v49, %s2681_s15 }
 0x1af   : > { %1205 = vrot.lane.b32.xlu0 %v2960_v47, %s2670_s14 }
 0x1b0   : > { %v3017_v50 = vpop.permute.xlu1 %517 }
 0x1b1   : > { %v3019_v51 = vpop.permute.xlu0 %521 }
 0x1b2   : > { %1057 = vrot.lane.b32.xlu1 %v2960_v47, %s2681_s15 }
 0x1b3   : > { %1209 = vrot.lane.b32.xlu0 %v2965_v49, %s2670_s14 }
 0x1b4   : > { %v3024_v52 = vpop.permute.xlu1 %1154 }
 0x1b5   : > { %4173 = vst [vmem:[#allocation19_spill] sm:$0xff] %v3024_v52  ;;  %v3026_v53 = vpop.permute.xlu0 %565 }
 0x1b6   : > { %1101 = vrot.lane.b32.xlu1 %v2965_v49, %s2682_s10 }
 0x1b7   : > { %1254 = vrot.lane.b32.xlu0 %v2960_v47, %s2672_s21 }
 0x1b8   : > { %v3031_v54 = vpop.permute.xlu1 %1158 }
 0x1b9   : > { %4174 = vst [vmem:[#allocation20_spill] sm:$0xff] %v3031_v54  ;;  %v3033_v55 = vpop.permute.xlu0 %569 }
 0x1ba   : > { %1106 = vrot.lane.b32.xlu1 %v2960_v47, %s2682_s10 }
 0x1bb   : > { %1258 = vrot.lane.b32.xlu0 %v2965_v49, %s2672_s21 }
 0x1bc   : > { %v3038_v56 = vpop.permute.xlu1 %1203 }
 0x1bd   : > { %4175 = vst [vmem:[#allocation21_spill] sm:$0xff] %v3038_v56  ;;  %v3040_v57 = vpop.permute.xlu0 %614 }
 0x1be   : > { %1301 = vrot.lane.b32.xlu1 %v2908_v35, %s2683_s12 }
 0x1bf   : > { %1303 = vrot.lane.b32.xlu0 %v2960_v47, %s2683_s12 }
 0x1c0   : > { %v3044_v58 = vpop.permute.xlu1 %1207 }
 0x1c1   : > { %4176 = vst [vmem:[#allocation22_spill] sm:$0xff] %v3044_v58  ;;  %v3046_v59 = vpop.permute.xlu0 %618  ;;  %v3520_v58 = vld [vmem:[%s4095_s7 + $0x24] sm:$0xf] }
 0x1c2   : > { %1305 = vrot.lane.b32.xlu1 %v2910_v36, %s2683_s12 }
 0x1c3   : > { %1307 = vrot.lane.b32.xlu0 %v2965_v49, %s2683_s12 }
 0x1c4   : > { %v3050_v60 = vpop.permute.xlu1 %1252 }
 0x1c5   : > { %4177 = vst [vmem:[#allocation23_spill] sm:$0xff] %v3050_v60  ;;  %v3055_v62 = vpop.permute.xlu0 %663 }
 0x1c6   : > { %1742 = vperm.xlu1 %2514, %v1739_v33   ;;  %v2273_v33 = vld [vmem:[%s4095_s7 + $0xc] sm:$0xf] }
 0x1c7   : > { %1905 = vperm.xlu0 %2513, %v1899_v61  }
 0x1c8   : > { %v3067_v2 = vpop.permute.xlu1 %1256 }
 0x1c9   : > { %4178 = vst [vmem:[#allocation24_spill] sm:$0xff] %v3067_v2  ;;  %v3072_v4 = vpop.permute.xlu0 %667 }
 0x1cb   : > { %1915 = vperm.xlu0 %2513, %v1901_v3  }
 0x1cc   : > { %v520_v9 = vpop.permute.xlu1 %519 }
 0x1cd   : > { %v3084_v10 = vpop.permute.xlu0 %712  ;;  %v524_v11 = vsel %vm523_vm1, %v3017_v50, %v520_v9  ;;  %v525_v12 = vsel %vm523_vm1, %v520_v9, %v3019_v51 }
 0x1ce   : > { %v3090_v13 = vmul.f32 %v545_v5, %v525_v12  ;;  %v3092_v14 = vmul.f32 %v1356_v6, %v524_v11  ;;  %v555_v45 = vmul.f32 %v541_v18, %v524_v11  ;;  %v3145_v48 = vmul.f32 %v1360_v19, %v525_v12  ;;  %v1900_v6 = vld [vmem:[%s4094_s6 + $0x8] sm:$0xff] }
 0x1cf   : > { %1910 = vperm.xlu1 %2514, %v1900_v6   ;;  %v643_v19 = vrot.slane %v3113_v27, %v2953_v44 }
 0x1d0   : > { %4179 = vst [vmem:[#allocation25_spill] sm:$0xff] %v3092_v14  ;;  %v563_v20 = vpop.permute.xlu1 %562  ;;  %4180 = vst [vmem:[#allocation26_spill] sm:$0xff] %v3145_v48 }
 0x1d1   : > { %v3102_v22 = vpop.permute.xlu0 %716  ;;  %v574_v23 = vsel %vm571_vm2, %v3033_v55, %v563_v20  ;;  %v579_v24 = vsel %vm571_vm2, %v563_v20, %v3026_v53  ;;  %v1418_v20 = vrot.slane %v3118_v28, %v2935_v39 }
 0x1d2   : > { %v3123_v29 = vmul.f32 %v586_v42, %v579_v24  ;;  %v3128_v30 = vmul.f32 %v598_v43, %v574_v23  ;;  %v3130_v31 = vmul.f32 %v1395_v15, %v574_v23  ;;  %v3132_v32 = vmul.f32 %v1399_v16, %v579_v24 }
 0x1d3   : > { %v1426_v42 = vrot.slane %v3118_v28, %v2953_v44  ;;  %v1430_v43 = vrot.slane %v3118_v28, %v2938_v40 }
 0x1d4   : > { %v568_v34 = vpop.permute.xlu1 %567 }
 0x1d5   : > { %v3147_v61 = vpop.permute.xlu0 %761  ;;  %v572_v3 = vsel %vm571_vm2, %v3026_v53, %v568_v34  ;;  %v573_v5 = vsel %vm571_vm2, %v568_v34, %v3033_v55  ;;  %v2290_v34 = vld [vmem:[%s4095_s7 + $0x54] sm:$0xf]  ;;  %vm1309_vm2 = vcmask 973824  }
 0x1d6   : > { %v604_v7 = vmul.f32 %v590_v21, %v572_v3  ;;  %v3159_v9 = vmul.f32 %v594_v46, %v573_v5  ;;  %v3161_v11 = vmul.f32 %v1387_v25, %v572_v3  ;;  %v3163_v12 = vmul.f32 %v1391_v26, %v573_v5  ;;  %v1902_v21 = vld [vmem:[%s4094_s6 + $0x18] sm:$0xff] }
 0x1d7   : > { %1920 = vperm.xlu1 %2514, %v1902_v21   ;;  %v696_v3 = vrot.slane %v2273_v33, %v2938_v40  ;;  %v3227_v21 = vld [vmem:[%s4095_s7 + $0x58] sm:$0xf] }
 0x1d8   : > { %4181 = vst [vmem:[#allocation27_spill] sm:$0xff] %v3161_v11  ;;  %4182 = vst [vmem:[#allocation28_spill] sm:$0xff] %v3163_v12  ;;  %v612_v15 = vpop.permute.xlu1 %611  ;;  %v2329_v16 = vpack.c.bf16 %v604_v7, %v555_v45  ;;  %v1457_v7 = vrot.slane %v2290_v34, %v2953_v44 }
 0x1d9   : > { %v3171_v18 = vpop.permute.xlu0 %765  ;;  %v623_v41 = vsel %vm620_vm4, %v3046_v59, %v612_v15  ;;  %v628_v46 = vsel %vm620_vm4, %v612_v15, %v3040_v57  ;;  %v1461_v15 = vrot.slane %v2290_v34, %v2938_v40 }
 0x1da   : > { %v3184_v23 = vmul.f32 %v635_v37, %v628_v46  ;;  %v3186_v24 = vmul.f32 %v647_v38, %v623_v41  ;;  %v3188_v25 = vmul.f32 %v1426_v42, %v623_v41  ;;  %v3190_v26 = vmul.f32 %v1430_v43, %v628_v46  ;;  %2330 = vmatprep.subr.bf16.mxu0 %v2329_v16 }
 0x1db   : > { %v684_v43 = vrot.slane %v2273_v33, %v2935_v39  ;;  %v639_v16 = vrot.slane %v3113_v27, %v3082_v8  ;;  %v692_v46 = vrot.slane %v2273_v33, %v2953_v44 }
 0x1dc   : > { %4183 = vst [vmem:[#allocation29_spill] sm:$0xff] %v3188_v25  ;;  %4184 = vst [vmem:[#allocation30_spill] sm:$0xff] %v3190_v26  ;;  %v617_v45 = vpop.permute.xlu1 %616 }
 0x1dd   : > { %v3198_v37 = vpop.permute.xlu0 %810  ;;  %v621_v38 = vsel %vm620_vm4, %v3040_v57, %v617_v45  ;;  %v622_v42 = vsel %vm620_vm4, %v617_v45, %v3046_v59  ;;  %v1422_v57 = vrot.slane %v3118_v28, %v3082_v8  ;;  %v688_v59 = vrot.slane %v2273_v33, %v3082_v8 }
 0x1de   : > { %v3206_v5 = vmul.f32 %v643_v19, %v622_v42  ;;  %v3208_v6 = vmul.f32 %v1418_v20, %v621_v38  ;;  %v1449_v19 = vrot.slane %v2290_v34, %v2935_v39  ;;  %v3222_v20 = vld [vmem:[%s4095_s7 + $0x10] sm:$0xf]  ;;  %v1453_v45 = vrot.slane %v2290_v34, %v3082_v8 }
 0x1df   : > { %v733_v14 = vrot.slane %v3222_v20, %v2935_v39  ;;  %v745_v11 = vrot.slane %v3222_v20, %v2938_v40  ;;  %v1492_v34 = vrot.slane %v3227_v21, %v2938_v40  ;;  %v3262_v48 = vmul.f32 %v1422_v57, %v622_v42 }
 0x1e0   : > { %4185 = vst [vmem:[#allocation31_spill] sm:$0xff] %v3208_v6  ;;  %v661_v41 = vpop.permute.xlu1 %660 }
 0x1e1   : > { %v3229_v27 = vpop.permute.xlu0 %814  ;;  %v672_v28 = vsel %vm669_vm5, %v3072_v4, %v661_v41  ;;  %v677_v33 = vsel %vm669_vm5, %v661_v41, %v3055_v62  ;;  %v1488_v41 = vrot.slane %v3227_v21, %v2953_v44  ;;  %4188 = vst [vmem:[#allocation34_spill] sm:$0xff] %v3262_v48 }
 0x1e2   : > { %v3236_v0 = vmul.f32 %v684_v43, %v677_v33  ;;  %v3238_v53 = vmul.f32 %v696_v3, %v672_v28  ;;  %v3240_v17 = vmul.f32 %v1457_v7, %v672_v28  ;;  %v3242_v55 = vmul.f32 %v1461_v15, %v677_v33  ;;  %v2275_v28 = vld [vmem:[%s4095_s7 + $0x14] sm:$0xf] }
 0x1e3   : > { %v3260_v33 = vmul.f32 %v639_v16, %v621_v38 }
 0x1e4   : > { %4186 = vst [vmem:[#allocation32_spill] sm:$0xff] %v3240_v17  ;;  %4187 = vst [vmem:[#allocation33_spill] sm:$0xff] %v3242_v55  ;;  %v666_v7 = vpop.permute.xlu1 %665  ;;  %v3339_v55 = vld [vmem:[%s4095_s7 + $0x60] sm:$0xf] }
 0x1e5   : > { %v3264_v12 = vpop.permute.xlu0 %859  ;;  %v670_v2 = vsel %vm669_vm5, %v3055_v62, %v666_v7  ;;  %v671_v43 = vsel %vm669_vm5, %v666_v7, %v3072_v4  ;;  %4194 = vst [vmem:[#allocation40_spill] sm:$0xff] %v3339_v55 }
 0x1e6   : > { %v3270_v3 = vmul.f32 %v688_v59, %v670_v2  ;;  %v3272_v25 = vmul.f32 %v692_v46, %v671_v43  ;;  %v3274_v15 = vmul.f32 %v1449_v19, %v670_v2  ;;  %v3276_v17 = vmul.f32 %v1453_v45, %v671_v43 }
 0x1e7   : > { %v741_v46 = vrot.slane %v3222_v20, %v2953_v44  ;;  %v1480_v19 = vrot.slane %v3227_v21, %v2935_v39 }
 0x1e8   : > { %4189 = vst [vmem:[#allocation35_spill] sm:$0xff] %v3274_v15  ;;  %4190 = vst [vmem:[#allocation36_spill] sm:$0xff] %v3276_v17  ;;  %v710_v16 = vpop.permute.xlu1 %709  ;;  %v737_v15 = vrot.slane %v3222_v20, %v3082_v8 }
 0x1e9   : > { %v3286_v57 = vpop.permute.xlu0 %863  ;;  %v721_v2 = vsel %vm718_vm6, %v3102_v22, %v710_v16  ;;  %v726_v59 = vsel %vm718_vm6, %v710_v16, %v3084_v10  ;;  %v2292_v16 = vld [vmem:[%s4095_s7 + $0x5c] sm:$0xf] }
 0x1ea   : > { %v3296_v45 = vmul.f32 %v733_v14, %v726_v59  ;;  %v3298_v43 = vmul.f32 %v745_v11, %v721_v2  ;;  %v3300_v7 = vmul.f32 %v1488_v41, %v721_v2  ;;  %v3302_v38 = vmul.f32 %v1492_v34, %v726_v59 }
 0x1eb   : > { %v782_v41 = vrot.slane %v2275_v28, %v2935_v39  ;;  %v794_v34 = vrot.slane %v2275_v28, %v2938_v40  ;;  %v1519_v62 = vrot.slane %v2292_v16, %v2953_v44  ;;  %v1523_v6 = vrot.slane %v2292_v16, %v2938_v40 }
 0x1ec   : > { %4191 = vst [vmem:[#allocation37_spill] sm:$0xff] %v3300_v7  ;;  %4192 = vst [vmem:[#allocation38_spill] sm:$0xff] %v3302_v38  ;;  %v715_v4 = vpop.permute.xlu1 %714  ;;  %v1515_v48 = vrot.slane %v2292_v16, %v3082_v8 }
 0x1ed   : > { %v3310_v42 = vpop.permute.xlu0 %908  ;;  %v719_v14 = vsel %vm718_vm6, %v3084_v10, %v715_v4  ;;  %v720_v11 = vsel %vm718_vm6, %v715_v4, %v3102_v22  ;;  %v1484_v10 = vrot.slane %v3227_v21, %v3082_v8  ;;  %v786_v22 = vrot.slane %v2275_v28, %v3082_v8 }
 0x1ee   : > { %v3318_v2 = vmul.f32 %v741_v46, %v720_v11  ;;  %v3320_v59 = vmul.f32 %v1480_v19, %v719_v14  ;;  %v790_v4 = vrot.slane %v2275_v28, %v2953_v44  ;;  %v1511_v46 = vrot.slane %v2292_v16, %v2935_v39  ;;  %v3334_v19 = vld [vmem:[%s4095_s7 + $0x18] sm:$0xf] }
 0x1ef   : > { %v831_v35 = vrot.slane %v3334_v19, %v2935_v39  ;;  %v843_v47 = vrot.slane %v3334_v19, %v2938_v40  ;;  %v1554_v16 = vrot.slane %v3339_v55, %v2938_v40  ;;  %v3374_v56 = vmul.f32 %v1484_v10, %v720_v11 }
 0x1f0   : > { %4193 = vst [vmem:[#allocation39_spill] sm:$0xff] %v3320_v59  ;;  %v759_v26 = vpop.permute.xlu1 %758 }
 0x1f1   : > { %v3341_v20 = vpop.permute.xlu0 %912  ;;  %v770_v21 = vsel %vm767_vm7, %v3171_v18, %v759_v26  ;;  %v775_v28 = vsel %vm767_vm7, %v759_v26, %v3147_v61  ;;  %v1550_v26 = vrot.slane %v3339_v55, %v2953_v44  ;;  %4197 = vst [vmem:[#allocation43_spill] sm:$0xff] %v3374_v56 }
 0x1f2   : > { %v3348_v17 = vmul.f32 %v782_v41, %v775_v28  ;;  %v3350_v36 = vmul.f32 %v794_v34, %v770_v21  ;;  %v3352_v60 = vmul.f32 %v1519_v62, %v770_v21  ;;  %v3354_v49 = vmul.f32 %v1523_v6, %v775_v28  ;;  %v3419_v21 = vld [vmem:[%s4095_s7 + $0x1c] sm:$0xf] }
 0x1f3   : > { %v3372_v28 = vmul.f32 %v737_v15, %v719_v14 }
 0x1f4   : > { %4195 = vst [vmem:[#allocation41_spill] sm:$0xff] %v3352_v60  ;;  %4196 = vst [vmem:[#allocation42_spill] sm:$0xff] %v3354_v49  ;;  %v764_v6 = vpop.permute.xlu1 %763 }
 0x1f5   : > { %v3376_v54 = vpop.permute.xlu0 %957  ;;  %v768_v52 = vsel %vm767_vm7, %v3147_v61, %v764_v6  ;;  %v769_v41 = vsel %vm767_vm7, %v764_v6, %v3171_v18 }
 0x1f6   : > { %v3382_v62 = vmul.f32 %v786_v22, %v768_v52  ;;  %v3384_v7 = vmul.f32 %v790_v4, %v769_v41  ;;  %v3386_v34 = vmul.f32 %v1511_v46, %v768_v52  ;;  %v3388_v60 = vmul.f32 %v1515_v48, %v769_v41 }
 0x1f7   : > { %v839_v22 = vrot.slane %v3334_v19, %v2953_v44  ;;  %v1542_v4 = vrot.slane %v3339_v55, %v2935_v39 }
 0x1f8   : > { %4198 = vst [vmem:[#allocation44_spill] sm:$0xff] %v3386_v34  ;;  %4199 = vst [vmem:[#allocation45_spill] sm:$0xff] %v3388_v60  ;;  %v808_v11 = vpop.permute.xlu1 %807 }
 0x1f9   : > { %v3398_v10 = vpop.permute.xlu0 %961  ;;  %v819_v52 = vsel %vm816_vm8, %v3229_v27, %v808_v11  ;;  %v824_v48 = vsel %vm816_vm8, %v808_v11, %v3198_v37  ;;  %v3424_v11 = vld [vmem:[%s4095_s7 + $0x64] sm:$0xf] }
 0x1fa   : > { %v3408_v46 = vmul.f32 %v831_v35, %v824_v48  ;;  %v3410_v41 = vmul.f32 %v843_v47, %v819_v52  ;;  %v3412_v6 = vmul.f32 %v1550_v26, %v819_v52  ;;  %v3414_v15 = vmul.f32 %v1554_v16, %v824_v48  ;;  %4203 = vst [vmem:[#allocation49_spill] sm:$0xff] %v3424_v11 }
 0x1fb   : > { %v880_v16 = vrot.slane %v3419_v21, %v2935_v39  ;;  %v892_v52 = vrot.slane %v3419_v21, %v2938_v40  ;;  %v1585_v61 = vrot.slane %v3424_v11, %v2938_v40 }
 0x1fc   : > { %4200 = vst [vmem:[#allocation46_spill] sm:$0xff] %v3408_v46  ;;  %4201 = vst [vmem:[#allocation47_spill] sm:$0xff] %v3412_v6  ;;  %v813_v18 = vpop.permute.xlu1 %812  ;;  %v537_v6 = vrot.slane %v3060_v63, %v2935_v39 }
 0x1fd   : > { %4202 = vst [vmem:[#allocation48_spill] sm:$0xff] %v3414_v15  ;;  %v3426_v35 = vpop.permute.xlu0 %1006  ;;  %v3430_v47 = vsel %vm816_vm8, %v3198_v37, %v813_v18  ;;  %v3434_v26 = vsel %vm816_vm8, %v813_v18, %v3229_v27  ;;  %v1581_v37 = vrot.slane %v3424_v11, %v2953_v44 }
 0x1fe   : > { %4204 = vst [vmem:[#allocation50_spill] sm:$0xff] %v3434_v26  ;;  %v3441_v48 = vmul.f32 %v839_v22, %v3434_v26  ;;  %v3444_v14 = vmul.f32 %v1542_v4, %v3430_v47  ;;  %v888_v22 = vrot.slane %v3419_v21, %v2953_v44  ;;  %v1573_v4 = vrot.slane %v3424_v11, %v2935_v39 }
 0x200   : > { %4205 = vst [vmem:[#allocation51_spill] sm:$0xff] %v3441_v48  ;;  %4206 = vst [vmem:[#allocation52_spill] sm:$0xff] %v3444_v14  ;;  %v857_v27 = vpop.permute.xlu1 %856  ;;  %v1364_v14 = vrot.slane %v3065_v1, %v2953_v44 }
 0x201   : > { %v3450_v18 = vpop.permute.xlu0 %1010  ;;  %v868_v59 = vsel %vm865_vm9, %v3286_v57, %v857_v27  ;;  %v873_v34 = vsel %vm865_vm9, %v857_v27, %v3264_v12  ;;  %v3533_v27 = vld [vmem:[%s4095_s7 + $0x38] sm:$0xf] }
 0x202   : > { %v3460_v38 = vmul.f32 %v880_v16, %v873_v34  ;;  %v3462_v49 = vmul.f32 %v892_v52, %v868_v59  ;;  %v3464_v56 = vmul.f32 %v1581_v37, %v868_v59  ;;  %v3466_v60 = vmul.f32 %v1585_v61, %v873_v34 }
 0x203   : > { %v1368_v37 = vrot.slane %v3065_v1, %v2938_v40  ;;  %v986_v1 = vrot.slane %v3520_v58, %v2953_v44 }
 0x204   : > { %4207 = vst [vmem:[#allocation53_spill] sm:$0xff] %v3460_v38  ;;  %4208 = vst [vmem:[#allocation54_spill] sm:$0xff] %v3464_v56  ;;  %v862_v55 = vpop.permute.xlu1 %861  ;;  %v549_v56 = vrot.slane %v3060_v63, %v2938_v40  ;;  %v3554_v63 = vld [vmem:[%s4095_s7 + $0x28] sm:$0xf]  ;;  %v3571_v38 = vld [vmem:[%s4095_s7 + $0x3c] sm:$0xf] }
 0x205   : > { %4209 = vst [vmem:[#allocation55_spill] sm:$0xff] %v3466_v60  ;;  %v3476_v11 = vpop.permute.xlu0 %1055  ;;  %v3480_v59 = vsel %vm865_vm9, %v3264_v12, %v862_v55  ;;  %v3484_v34 = vsel %vm865_vm9, %v862_v55, %v3286_v57 }
 0x206   : > { %4210 = vst [vmem:[#allocation56_spill] sm:$0xff] %v3484_v34  ;;  %v3487_v61 = vmul.f32 %v888_v22, %v3484_v34  ;;  %v3490_v52 = vmul.f32 %v1573_v4, %v3480_v59  ;;  %v3509_v22 = vld [vmem:[%s4095_s7 + $0x20] sm:$0xf] }
 0x208   : > { %4211 = vst [vmem:[#allocation57_spill] sm:$0xff] %v3487_v61  ;;  %4212 = vst [vmem:[#allocation58_spill] sm:$0xff] %v3490_v52  ;;  %v3496_v16 = vpop.permute.xlu1 %905 }
 0x209   : > { %v3498_v12 = vpop.permute.xlu0 %1059 }
 0x20c   : > { %v3500_v26 = vpop.permute.xlu1 %910 }
 0x20d   : > { %v3502_v55 = vpop.permute.xlu0 %1104 }
 0x20e   : > { %4213 = vst [vmem:[#allocation59_spill] sm:$0xff] %v3502_v55 }
 0x210   : > { %v3504_v57 = vpop.permute.xlu1 %954 }
 0x211   : > { %v3511_v4 = vpop.permute.xlu0 %1108 }
 0x212   : > { %4214 = vst [vmem:[#allocation60_spill] sm:$0xff] %v3511_v4 }
 0x214   : > { %v3543_v34 = vpop.permute.xlu1 %959 }
 0x215   : > { %v512_v4 = vpop.permute.xlu0 %511 }
 0x216   : > { %v526_v60 = vsel %vm523_vm1, %v3019_v51, %v512_v4  ;;  %v531_v15 = vsel %vm523_vm1, %v512_v4, %v3017_v50  ;;  %v3576_v50 = vld [vmem:[%s4095_s7 + $0x2c] sm:$0xf]  ;;  %v3613_v51 = vld [vmem:[%s4095_s7 + $0x30] sm:$0xf]  ;;  %vm1260_vm1 = vcmask 982016  }
 0x217   : > { %v554_v48 = vmul.f32 %v537_v6, %v531_v15  ;;  %v557_v61 = vmul.f32 %v549_v56, %v526_v60  ;;  %v3564_v52 = vmul.f32 %v1364_v14, %v526_v60  ;;  %v3566_v46 = vmul.f32 %v1368_v37, %v531_v15  ;;  %v3600_v60 = vld [vmem:[%s4095_s7 + $0x40] sm:$0xf] }
 0x218   : > { %v3584_v15 = vpop.permute.xlu1 %1003  ;;  %v4215_v14 = vpack.c.bf16 %v3270_v3, %v3260_v33  ;;  %v971_v3 = vsel %vm963_vm11, %v3504_v57, %v3376_v54  ;;  %v1129_v33 = vrot.slane %v3613_v51, %v3082_v8 }
 0x219   : > { %v2331_v6 = vpack.c.bf16 %v3123_v29, %v554_v48  ;;  %v3591_v4 = vpop.permute.xlu0 %1156  ;;  %v2381_v56 = vpack.c.bf16 %v3128_v30, %v557_v61  ;;  %v1088_v29 = vrot.slane %v3576_v50, %v2938_v40  ;;  %v1080_v30 = vrot.slane %v3576_v50, %v3082_v8  ;;  %v3648_v61 = vld [vmem:[%s4095_s7 + $0x44] sm:$0xf] }
 0x21b   : > { %2332 = vmatpush1.bf16.msra.mxu0 %v2331_v6  ;;  %2382 = vmatprep.subr.bf16.mxu1 %v2381_v56  ;;  %v4216_v56 = vrot.slane %v3419_v21, %v3082_v8  ;;  %v3667_v21 = vsel %vm914_vm10, %v3496_v16, %v3310_v42 }
 0x21c   : > { %2334 = vmatprep.subr.bf16.mxu0 %v4215_v14  ;;  %v3625_v55 = vpop.permute.xlu1 %1008  ;;  %v4217_v14 = vpack.c.bf16 %v3159_v9, %v3090_v13  ;;  %v4219_v13 = vpack.c.bf16 %v3236_v0, %v3184_v23  ;;  %v1133_v9 = vrot.slane %v3613_v51, %v2953_v44  ;;  %v4221_v0 = vpack.c.bf16 %v3382_v62, %v3372_v28 }
 0x21d   : > { %v3635_v37 = vpop.permute.xlu0 %1160  ;;  %v898_v48 = vmul.f32 %v4216_v56, %v3480_v59  ;;  %v964_v59 = vsel %vm963_vm11, %v3376_v54, %v3543_v34  ;;  %v4218_v56 = vpack.c.bf16 %v3238_v53, %v3186_v24  ;;  %v966_v54 = vsel %vm963_vm11, %v3398_v10, %v3504_v57 }
 0x21e   : > { %2384 = vmatpush1.bf16.msra.mxu1 %v4217_v14  ;;  %v4220_v14 = vrot.slane %v3334_v19, %v3082_v8  ;;  %v965_v53 = vsel %vm963_vm11, %v3543_v34, %v3398_v10  ;;  %v1325_v24 = vrot.slane %v3648_v61, %v2935_v39  ;;  %v3698_v19 = vsel %vm914_vm10, %v3341_v20, %v3496_v16 }
 0x21f   : > { %2386 = vmatprep.subr.bf16.mxu1 %v4218_v56  ;;  %2336 = vmatpush1.bf16.msra.mxu0 %v4219_v13  ;;  %v3708_v10 = vsel %vm914_vm10, %v3500_v26, %v3341_v20  ;;  %v4222_v62 = vrot.slane %v3520_v58, %v2935_v39  ;;  %v4223_v16 = vrot.slane %v3509_v22, %v2935_v39 }
 0x220   : > { %v849_v6 = vmul.f32 %v4220_v14, %v3430_v47  ;;  %2338 = vmatprep.subr.bf16.mxu0 %v4221_v0  ;;  %v1053_v23 = vpop.permute.xlu1 %1052  ;;  %v3703_v47 = vsel %vm914_vm10, %v3310_v42, %v3500_v26  ;;  %v4224_v56 = vrot.slane %v3520_v58, %v3082_v8  ;;  %v4225_v13 = vpack.c.bf16 %v3272_v25, %v3206_v5 }
 0x221   : > { %v995_v28 = vmul.f32 %v4222_v62, %v971_v3  ;;  %v1206_v34 = vpop.permute.xlu0 %1205  ;;  %v946_v57 = vmul.f32 %v4223_v16, %v3667_v21  ;;  %v1337_v26 = vrot.slane %v3648_v61, %v2938_v40  ;;  %v4226_v3 = vrot.slane %v3520_v58, %v2938_v40 }
 0x222   : > { %v996_v42 = vmul.f32 %v4224_v56, %v964_v59  ;;  %2388 = vmatpush1.bf16.msra.mxu1 %v4225_v13  ;;  %v2341_v20 = vpack.c.bf16 %v898_v48, %v849_v6  ;;  %v997_v0 = vmul.f32 %v986_v1, %v965_v53  ;;  %v1013_v59 = vsel %vm1012_vm12, %v3426_v35, %v3625_v55 }
 0x223   : > { %v998_v14 = vmul.f32 %v4226_v3, %v966_v54  ;;  %v4227_v25 = vpack.c.bf16 %v3350_v36, %v3298_v43  ;;  %v4228_v5 = vpack.c.bf16 %v3348_v17, %v3296_v45  ;;  %v4229_v48 = vrot.slane %v3509_v22, %v2938_v40 }
 0x224   : > { %v4230_v58 = vrot.slane %v3509_v22, %v3082_v8  ;;  %v4231_v54 = vrot.slane %v3509_v22, %v2953_v44  ;;  %v1058_v43 = vpop.permute.xlu1 %1057  ;;  %v1329_v17 = vrot.slane %v3648_v61, %v3082_v8  ;;  %v2347_v45 = vpack.c.bf16 %v995_v28, %v946_v57 }
 0x225   : > { %2390 = vmatprep.subr.bf16.mxu1 %v4227_v25  ;;  %2340 = vmatpush1.bf16.msra.mxu0 %v4228_v5  ;;  %v949_v6 = vmul.f32 %v4229_v48, %v3698_v19  ;;  %v1064_v53 = vsel %vm1061_vm14, %v3498_v12, %v1053_v23  ;;  %v1069_v62 = vsel %vm1061_vm14, %v1053_v23, %v3476_v11  ;;  %v3758_v16 = vpop.permute.xlu0 %1209  ;;  %v4236_v5 = vld [vmem:[#allocation46_spill] sm:$0xff] }
 0x226   : > { %v947_v1 = vmul.f32 %v4230_v58, %v3703_v47  ;;  %v948_v36 = vmul.f32 %v4231_v54, %v3708_v10  ;;  %2342 = vmatprep.subr.bf16.mxu0 %v2341_v20  ;;  %v1062_v56 = vsel %vm1061_vm14, %v3476_v11, %v1058_v43  ;;  %v1020_v22 = vsel %vm1012_vm12, %v3584_v15, %v3426_v35  ;;  %v4235_v35 = vld [vmem:[#allocation53_spill] sm:$0xff]  ;;  %v4238_v58 = vld [vmem:[#allocation22_spill] sm:$0xff] }
 0x227   : > { %v4232_v13 = vrot.slane %v3554_v63, %v3082_v8  ;;  %v4233_v28 = vpack.c.bf16 %v3384_v7, %v3318_v2  ;;  %v1094_v57 = vmul.f32 %v1080_v30, %v1062_v56  ;;  %v1015_v25 = vsel %vm1012_vm12, %v3450_v18, %v3584_v15 }
 0x228   : > { %v2345_v3 = vpack.c.bf16 %v996_v42, %v947_v1  ;;  %v2399_v23 = vpack.c.bf16 %v997_v0, %v948_v36  ;;  %v4234_v11 = vpack.c.bf16 %v3462_v49, %v3410_v41  ;;  %v4237_v48 = vpack.c.bf16 %v4235_v35, %v4236_v5  ;;  %v1102_v49 = vpop.permute.xlu1 %1101  ;;  %v4240_v42 = vld [vmem:[#allocation19_spill] sm:$0xff] }
 0x229   : > { %v1045_v20 = vmul.f32 %v4232_v13, %v1013_v59  ;;  %2392 = vmatpush1.bf16.msra.mxu1 %v4233_v28  ;;  %v2397_v59 = vpack.c.bf16 %v998_v14, %v949_v6  ;;  %v1213_v7 = vsel %vm1211_vm15, %v1206_v34, %v4238_v58  ;;  %v4239_v2 = vrot.slane %v3576_v50, %v2935_v39  ;;  %v4241_v14 = vld [vmem:[#allocation20_spill] sm:$0xff]  ;;  %v4244_v13 = vld [vmem:[#allocation57_spill] sm:$0xff] }
 0x22a   : > { %2394 = vmatprep.subr.bf16.mxu1 %v4234_v11  ;;  %2344 = vmatpush1.bf16.msra.mxu0 %v4237_v48  ;;  %v1096_v15 = vmul.f32 %v1088_v29, %v1064_v53  ;;  %v1163_v0 = vsel %vm1162_vm13, %v4240_v42, %v3591_v4  ;;  %v1164_v6 = vsel %vm1162_vm13, %v3591_v4, %v4241_v14  ;;  %v4247_v4 = vld [vmem:[#allocation60_spill] sm:$0xff] }
 0x22b   : > { %v1093_v30 = vmul.f32 %v4239_v2, %v1069_v62  ;;  %2346 = vmatprep.subr.bf16.mxu0 %v2345_v3  ;;  %v2349_v41 = vpack.c.bf16 %v1094_v57, %v1045_v20  ;;  %v4242_v1 = vrot.slane %v3554_v63, %v2935_v39  ;;  %v1063_v36 = vsel %vm1061_vm14, %v1058_v43, %v3498_v12  ;;  %v1255_v62 = vpop.permute.xlu0 %1254  ;;  %v4245_v20 = vld [vmem:[#allocation51_spill] sm:$0xff]  ;;  %v4249_v43 = vld [vmem:[#allocation21_spill] sm:$0xff] }
 0x22c   : > { %v4243_v29 = vrot.slane %v3554_v63, %v2938_v40  ;;  %v1014_v56 = vsel %vm1012_vm12, %v3625_v55, %v3450_v18  ;;  %v4246_v28 = vpack.c.bf16 %v4244_v13, %v4245_v20  ;;  %v1113_v57 = vsel %vm1110_vm0, %v4247_v4, %v1102_v49 }
 0x22d   : > { %v1044_v54 = vmul.f32 %v4242_v1, %v1020_v22  ;;  %v4248_v22 = vld [vmem:[#allocation59_spill] sm:$0xff]  ;;  %v1171_v12 = vsel %vm1162_vm13, %v3635_v37, %v4240_v42  ;;  %v4250_v18 = vrot.slane %v3571_v38, %v3082_v8  ;;  %v1220_v35 = vsel %vm1211_vm15, %v3758_v16, %v4249_v43 }
 0x22e   : > { %v1047_v53 = vmul.f32 %v4243_v29, %v1015_v25  ;;  %2396 = vmatpush1.bf16.msra.mxu1 %v4246_v28  ;;  %v1118_v3 = vsel %vm1110_vm0, %v1102_v49, %v4248_v22  ;;  %v1212_v25 = vsel %vm1211_vm15, %v4249_v43, %v1206_v34  ;;  %2348 = vmatpush1.bf16.msra.mxu0 %v2347_v45  ;;  %v1107_v49 = vpop.permute.xlu1 %1106  ;;  %v4260_v28 = vld [vmem:[#allocation17_spill] sm:$0xff] }
 0x22f   : > { %v1245_v55 = vmul.f32 %v4250_v18, %v1213_v7  ;;  %2398 = vmatprep.subr.bf16.mxu1 %v2397_v59  ;;  %v2351_v11 = vpack.c.bf16 %v1093_v30, %v1044_v54  ;;  %v4251_v5 = vrot.slane %v3576_v50, %v2953_v44  ;;  %2350 = vmatprep.subr.bf16.mxu0 %v2349_v41  ;;  %v1259_v7 = vpop.permute.xlu0 %1258  ;;  %v4263_v18 = vld [vmem:[#allocation23_spill] sm:$0xff] }
 0x230   : > { %v2401_v2 = vpack.c.bf16 %v1096_v15, %v1047_v53  ;;  %v4252_v34 = vrot.slane %v3613_v51, %v2935_v39  ;;  %v4253_v59 = vrot.slane %v3613_v51, %v2938_v40  ;;  %v1111_v30 = vsel %vm1110_vm0, %v4248_v22, %v1107_v49 }
 0x231   : > { %v1095_v48 = vmul.f32 %v4251_v5, %v1063_v36  ;;  %v1112_v1 = vsel %vm1110_vm0, %v1107_v49, %v4247_v4  ;;  %v4254_v50 = vrot.slane %v3533_v27, %v2935_v39  ;;  %v4255_v41 = vrot.slane %v3554_v63, %v2953_v44 }
 0x232   : > { %v1142_v42 = vmul.f32 %v4252_v34, %v1118_v3  ;;  %v1145_v45 = vmul.f32 %v4253_v59, %v1113_v57  ;;  %2400 = vmatpush1.bf16.msra.mxu1 %v2399_v23  ;;  %v1143_v36 = vmul.f32 %v1129_v33, %v1111_v30  ;;  %v1144_v29 = vmul.f32 %v1133_v9, %v1112_v1  ;;  %v1302_v20 = vpop.permute.xlu1 %1301  ;;  %v4262_v3 = vld [vmem:[#allocation18_spill] sm:$0xff] }
 0x233   : > { %v1195_v15 = vmul.f32 %v4254_v50, %v1163_v0  ;;  %v1046_v54 = vmul.f32 %v4255_v41, %v1014_v56  ;;  %v4256_v53 = vrot.slane %v3533_v27, %v3082_v8  ;;  %v1165_v0 = vsel %vm1162_vm13, %v4241_v14, %v3635_v37  ;;  %2402 = vmatprep.subr.bf16.mxu1 %v2401_v2  ;;  %v4261_v14 = vld [vmem:[#allocation15_spill] sm:$0xff]  ;;  %v1304_v22 = vpop.permute.xlu0 %1303 }
 0x234   : > { %v4257_v63 = vrot.slane %v3533_v27, %v2938_v40  ;;  %2352 = vmatpush1.bf16.msra.mxu0 %v2351_v11  ;;  %v4258_v33 = vrot.slane %v3571_v38, %v2935_v39  ;;  %v4259_v9 = vrot.slane %v3571_v38, %v2938_v40  ;;  %v2353_v4 = vpack.c.bf16 %v4260_v28, %v1143_v36  ;;  %v4264_v11 = vld [vmem:[#allocation16_spill] sm:$0xff] }
 0x235   : > { %v1196_v13 = vmul.f32 %v4256_v53, %v1164_v6  ;;  %v2403_v6 = vpack.c.bf16 %v1095_v48, %v1046_v54  ;;  %v1214_v37 = vsel %vm1211_vm15, %v4238_v58, %v3758_v16  ;;  %v2355_v57 = vpack.c.bf16 %v4261_v14, %v1142_v42  ;;  %v4266_v16 = vld [vmem:[#allocation24_spill] sm:$0xff] }
 0x236   : > { %v1198_v23 = vmul.f32 %v4257_v63, %v1171_v12  ;;  %v1244_v51 = vmul.f32 %v4258_v33, %v1212_v25  ;;  %v1247_v56 = vmul.f32 %v4259_v9, %v1220_v35  ;;  %v2405_v12 = vpack.c.bf16 %v4262_v3, %v1145_v45  ;;  %2354 = vmatprep.subr.bf16.mxu0 %v2353_v4  ;;  %v4277_v4 = vld [vmem:[#allocation27_spill] sm:$0xff]  ;;  %v4281_v3 = vld [vmem:[#allocation36_spill] sm:$0xff] }
 0x237   : > { %v2357_v43 = vpack.c.bf16 %v1245_v55, %v1196_v13  ;;  %v1261_v25 = vsel %vm1260_vm1, %v4263_v18, %v1255_v62  ;;  %v2407_v5 = vpack.c.bf16 %v4264_v11, %v1144_v29  ;;  %2404 = vmatpush1.bf16.msra.mxu1 %v2403_v6  ;;  %v1310_v35 = vsel %vm1309_vm2, %v1302_v20, %v1304_v22  ;;  %v4272_v6 = vld [vmem:[#allocation28_spill] sm:$0xff] }
 0x238   : > { %v4265_v48 = vrot.slane %v3533_v27, %v2953_v44  ;;  %v1262_v58 = vsel %vm1260_vm1, %v1255_v62, %v4266_v16  ;;  %2406 = vmatprep.subr.bf16.mxu1 %v2405_v12  ;;  %2356 = vmatpush1.bf16.msra.mxu0 %v2355_v57  ;;  %v1333_v55 = vrot.slane %v3648_v61, %v2953_v44  ;;  %v1306_v27 = vpop.permute.xlu1 %1305  ;;  %v4280_v57 = vld [vmem:[#allocation40_spill] sm:$0xff]  ;;  %v4282_v12 = vld [vmem:[#allocation34_spill] sm:$0xff] }
 0x239   : > { %v2359_v49 = vpack.c.bf16 %v1244_v51, %v1195_v15  ;;  %v4267_v34 = vrot.slane %v3571_v38, %v2953_v44  ;;  %v1269_v59 = vsel %vm1260_vm1, %v1259_v7, %v4263_v18  ;;  %2358 = vmatprep.subr.bf16.mxu0 %v2357_v43  ;;  %v2409_v45 = vpack.c.bf16 %v1247_v56, %v1198_v23  ;;  %v1308_v15 = vpop.permute.xlu0 %1307  ;;  %v4284_v18 = vld [vmem:[#allocation56_spill] sm:$0xff] }
 0x23a   : > { %v1197_v2 = vmul.f32 %v4265_v48, %v1165_v0  ;;  %v4268_v30 = vrot.slane %v3600_v60, %v2935_v39  ;;  %v1263_v1 = vsel %vm1260_vm1, %v4266_v16, %v1259_v7  ;;  %v1342_v50 = vmul.f32 %v1325_v24, %v1310_v35  ;;  %v4289_v35 = vld [vmem:[#allocation35_spill] sm:$0xff]  ;;  %v4292_v16 = vld [vmem:[#allocation50_spill] sm:$0xff] }
 0x23b   : > { %v1246_v42 = vmul.f32 %v4267_v34, %v1214_v37  ;;  %v1311_v38 = vsel %vm1309_vm2, %v1304_v22, %v1306_v27  ;;  %v4269_v41 = vrot.slane %v3600_v60, %v3082_v8  ;;  %2408 = vmatpush1.bf16.msra.mxu1 %v2407_v5  ;;  %v1318_v36 = vsel %vm1309_vm2, %v1308_v15, %v1302_v20  ;;  %v4273_v20 = vld [vmem:[#allocation26_spill] sm:$0xff]  ;;  %v4278_v37 = vld [vmem:[#allocation25_spill] sm:$0xff]  ;;  %v4290_v48 = vld [vmem:[#allocation31_spill] sm:$0xff] }
 0x23c   : > { %v1293_v62 = vmul.f32 %v4268_v30, %v1261_v25  ;;  %v1312_v29 = vsel %vm1309_vm2, %v1306_v27, %v1308_v15  ;;  %v1343_v7 = vmul.f32 %v1329_v17, %v1311_v38  ;;  %v4270_v53 = vrot.slane %v3600_v60, %v2938_v40  ;;  %2410 = vmatprep.subr.bf16.mxu1 %v2409_v45  ;;  %v4286_v5 = vld [vmem:[#allocation33_spill] sm:$0xff]  ;;  %v4299_v30 = vld [vmem:[#allocation42_spill] sm:$0xff]  ;;  %v4303_v15 = vld [vmem:[#allocation39_spill] sm:$0xff] }
 0x23d   : > { %v1294_v54 = vmul.f32 %v4269_v41, %v1262_v58  ;;  %v1345_v13 = vmul.f32 %v1337_v26, %v1318_v36  ;;  %v1344_v0 = vmul.f32 %v1333_v55, %v1312_v29  ;;  %2360 = vmatpush1.bf16.msra.mxu0 %v2359_v49  ;;  %v2411_v63 = vpack.c.bf16 %v1246_v42, %v1197_v2  ;;  %v4275_v26 = vld [vmem:[#allocation49_spill] sm:$0xff]  ;;  %v4294_v49 = vld [vmem:[#allocation43_spill] sm:$0xff]  ;;  %v2295_v42 = vld [vmem:[%s4095_s7 + $0x68] sm:$0xf] }
 0x23e   : > { %v1296_v24 = vmul.f32 %v4270_v53, %v1269_v59  ;;  %v4271_v23 = vrot.slane %v3600_v60, %v2953_v44  ;;  %v2363_v9 = vpack.c.bf16 %v1342_v50, %v1293_v62  ;;  %v4274_v61 = vpack.c.bf16 %v4272_v6, %v4273_v20  ;;  %v4293_v55 = vld [vmem:[#allocation45_spill] sm:$0xff]  ;;  %v4300_v62 = vld [vmem:[#allocation38_spill] sm:$0xff]  ;;  %v4302_v50 = vld [vmem:[#allocation44_spill] sm:$0xff] }
 0x23f   : > { %v2361_v51 = vpack.c.bf16 %v1343_v7, %v1294_v54  ;;  %2412 = vmatpush1.bf16.msra.mxu1 %v2411_v63  ;;  %v1577_v28 = vrot.slane %v4275_v26, %v3082_v8  ;;  %v4276_v60 = vpack.c.bf16 %v3132_v32, %v3566_v46  ;;  %v4279_v14 = vpack.c.bf16 %v4277_v4, %v4278_v37  ;;  %v4287_v32 = vld [vmem:[#allocation30_spill] sm:$0xff]  ;;  %v4297_v59 = vld [vmem:[#allocation29_spill] sm:$0xff]  ;;  %v4308_v53 = vld [vmem:[#allocation55_spill] sm:$0xff] }
 0x240   : > { %v1295_v33 = vmul.f32 %v4271_v23, %v1263_v1  ;;  %v2413_v56 = vpack.c.bf16 %v1345_v13, %v1296_v24  ;;  %v1546_v22 = vrot.slane %v4280_v57, %v3082_v8  ;;  %v4283_v43 = vpack.c.bf16 %v4281_v3, %v4282_v12  ;;  %v4305_v36 = vld [vmem:[#allocation41_spill] sm:$0xff]  ;;  %v4309_v24 = vld [vmem:[#allocation48_spill] sm:$0xff]  ;;  %v1896_v3 = vld [vmem:[%s4093_s5 + $0x8] sm:$0xff] }
 0x241   : > { %2362 = vmatprep.subr.bf16.mxu0 %v2361_v51  ;;  %v1591_v25 = vmul.f32 %v1577_v28, %v4284_v18  ;;  %v4285_v11 = vpack.c.bf16 %v3130_v31, %v3564_v52  ;;  %v4288_v46 = vpack.c.bf16 %v4286_v5, %v4287_v32  ;;  %v4291_v2 = vpack.c.bf16 %v4289_v35, %v4290_v48  ;;  %v4296_v52 = vld [vmem:[#allocation32_spill] sm:$0xff]  ;;  %v4306_v29 = vld [vmem:[#allocation37_spill] sm:$0xff]  ;;  %v4314_v51 = vld [vmem:[#allocation54_spill] sm:$0xff] }
 0x242   : > { %v2415_v17 = vpack.c.bf16 %v1344_v0, %v1295_v33  ;;  %2414 = vmatprep.subr.bf16.mxu1 %v2413_v56  ;;  %2364 = vmatpush1.bf16.msra.mxu0 %v2363_v9  ;;  %v1560_v58 = vmul.f32 %v1546_v22, %v4292_v16  ;;  %v4295_v34 = vpack.c.bf16 %v4293_v55, %v4294_v49  ;;  %v4311_v0 = vld [vmem:[#allocation58_spill] sm:$0xff]  ;;  %v4312_v63 = vld [vmem:[#allocation52_spill] sm:$0xff]  ;;  %v4315_v9 = vld [vmem:[#allocation47_spill] sm:$0xff]  ;;  %v4317_v6 = vmov 0.0  }
 0x243   : > { %2366 = vmatprep.subr.bf16.mxu0 %v4274_v61  ;;  %v1608_v31 = vrot.slane %v2295_v42, %v3082_v8  ;;  %v4298_v45 = vpack.c.bf16 %v4296_v52, %v4297_v59  ;;  %v4301_v1 = vpack.c.bf16 %v4299_v30, %v4300_v62  ;;  %v4304_v38 = vpack.c.bf16 %v4302_v50, %v4303_v15  ;;  %v1897_v12 = vld [vmem:[%s4093_s5 + $0x10] sm:$0xff]  ;;  %v2515_v35 = vld [vmem:[%s2874_s29] sm:$0xff]  ;;  %v2518_v50 = vld [vmem:[%s2874_s29 + $0x18] sm:$0xff] }
 0x244   : > { %2416 = vmatpush1.bf16.msra.mxu1 %v2415_v17  ;;  %v2377_v27 = vpack.c.bf16 %v1591_v25, %v1560_v58  ;;  %v1616_v41 = vrot.slane %v2295_v42, %v2938_v40  ;;  %v1604_v54 = vrot.slane %v2295_v42, %v2935_v39  ;;  %v4307_v7 = vpack.c.bf16 %v4305_v36, %v4306_v29  ;;  %v2516_v58 = vld [vmem:[%s2874_s29 + $0x8] sm:$0xff] }
 0x245   : > { %2418 = vmatprep.subr.bf16.mxu1 %v4276_v60  ;;  %v1622_v8 = vmul.f32 %v1608_v31, %v3708_v10  ;;  %v4310_v13 = vpack.c.bf16 %v4308_v53, %v4309_v24  ;;  %v4313_v23 = vpack.c.bf16 %v4311_v0, %v4312_v63  ;;  %v1612_v33 = vrot.slane %v2295_v42, %v2953_v44  ;;  %v1629_v10 = vld [vmem:[#allocation6] sm:$0xff]  ;;  %v1743_v44 = vpop.permute.xlu1 %1742  ;;  %v2520_v29 = vld [vmem:[%s2874_s29 + $0x28] sm:$0xff] }
 0x246   : > { %2368 = vmatpush1.bf16.msra.mxu0 %v4279_v14  ;;  %v1624_v40 = vmul.f32 %v1616_v41, %v3667_v21  ;;  %v1621_v39 = vmul.f32 %v1604_v54, %v3703_v47  ;;  %v4316_v56 = vpack.c.bf16 %v4314_v51, %v4315_v9  ;;  %v1906_v18 = vpop.permute.xlu0 %1905 }
 0x247   : > { %2370 = vmatprep.subr.bf16.mxu0 %v4283_v43  ;;  %v1623_v17 = vmul.f32 %v1612_v33, %v3698_v19  ;;  %v1895_v19 = vld [vmem:[%s4093_s5] sm:$0xff]  ;;  %v1898_v43 = vld [vmem:[%s4093_s5 + $0x18] sm:$0xff] }
 0x248   : > { %2420 = vmatpush1.bf16.msra.mxu1 %v4285_v11 }
 0x249   : > { %2422 = vmatprep.subr.bf16.mxu1 %v4288_v46 }
 0x24a   : > { %2372 = vmatpush1.bf16.msra.mxu0 %v4291_v2 }
 0x24b   : > { %2374 = vmatprep.subr.bf16.mxu0 %v4295_v34 }
 0x24c   : > { %2424 = vmatpush1.bf16.msra.mxu1 %v4298_v45  ;;  %v2517_v45 = vld [vmem:[%s2874_s29 + $0x10] sm:$0xff] }
 0x24d   : > { %2426 = vmatprep.subr.bf16.mxu1 %v4301_v1  ;;  %v1916_v1 = vpop.permute.xlu0 %1915 }
 0x24e   : > { %2376 = vmatpush1.bf16.msra.mxu0 %v4304_v38  ;;  %v1911_v46 = vpop.permute.xlu1 %1910  ;;  %v2519_v38 = vld [vmem:[%s2874_s29 + $0x20] sm:$0xff] }
 0x24f   : > { %2378 = vmatprep.subr.bf16.mxu0 %v2377_v27 }
 0x250   : > { %2428 = vmatpush1.bf16.msra.mxu1 %v4307_v7 }
 0x251   : > { %2430 = vmatprep.subr.bf16.mxu1 %v4310_v13 }
 0x252   : > { %2380 = vmatpush1.bf16.msra.mxu0 %v4313_v23 }
 0x253   : > { %1801 = vmatprep.subr.mxu0 %v1622_v8 }
 0x254   : > { %2432 = vmatpush1.bf16.msra.mxu1 %v4316_v56  ;;  %v2522_v56 = vld [vmem:[%s2874_s29 + $0x38] sm:$0xff] }
 0x255   : > { %1872 = vmatprep.subr.mxu1 %v1624_v40  ;;  %v2521_v40 = vld [vmem:[%s2874_s29 + $0x30] sm:$0xff] }
 0x256   : > { %1802 = vmatpush1.msra.mxu0 %v1621_v39  ;;  %v1921_v9 = vpop.permute.xlu1 %1920 }
 0x257   : > { %1814 = vmatmul.mubr.f32.vlgmr.msra.gmra.mrb[2].mxu0 %v1629_v10 }
 0x258   : > { %1999 = vmatprep.mubr.f32.mxu0 %v4317_v6  ;;  %1873 = vmatpush1.msra.mxu1 %v1623_v17 }
 0x259   : > { %1885 = vmatmul.mubr.f32.vlgmr.msra.gmra.mrb[2].mxu1 %v1629_v10 }
 0x25a   : > { %2088 = vmatprep.mubr.f32.mxu1 %v4317_v6 }
 0x32a   : > { %v1815_v21 = vpop.f32.mrb[2].mxu0 }
 0x32b   : > { %v1816_v20 = vadd.f32 %v1815_v21, %v1743_v44  ;;  %v1817_v47 = vpop.f32.mrb[3].mxu0 }
 0x32c   : > { %v1818_v61 = vadd.f32 %v1817_v47, %v1743_v44  ;;  %v1886_v26 = vpop.f32.mrb[2].mxu1 }
 0x32d   : > { %v1887_v28 = vadd.f32 %v1886_v26, %v1743_v44  ;;  %v1888_v4 = vpop.f32.mrb[3].mxu1  ;;  %v1891_v37 = vmax.f32 %v1816_v20, 0.0 }
 0x32e   : > { %v1892_v60 = vmax.f32 %v1818_v61, 0.0  ;;  %v1889_v14 = vadd.f32 %v1888_v4, %v1743_v44  ;;  %v2524_v61 = vld [vmem:[%s2874_s29 + $0x48] sm:$0xff] }
 0x32f   : > { %v1893_v22 = vmax.f32 %v1887_v28, 0.0 }
 0x330   : > { %1935 = vmatprep.subr.mxu0 %v1892_v60  ;;  %v1894_v57 = vmax.f32 %v1889_v14, 0.0 }
 0x331   : > { %1936 = vmatpush1.msra.mxu0 %v1891_v37 }
 0x332   : > { %2298 = vmatmul.mubr.msk.f32.vlgmr.msra.gmra.mrb[4].mxu0 %vm1012_vm12, %v1895_v19  ;;  %2024 = vmatprep.subr.mxu1 %v1894_v57 }
 0x333   : > { %2005 = vmatprep.mubr.f32.mxu0 %v4317_v6  ;;  %2025 = vmatpush1.msra.mxu1 %v1893_v22  ;;  %v2525_v22 = vld [vmem:[%s2874_s29 + $0x50] sm:$0xff] }
 0x334   : > { %2302 = vmatmul.mubr.msk.f32.vlgmr.msra.gmra.mrb[4].mxu1 %vm1012_vm12, %v1895_v19 }
 0x335   : > { %2094 = vmatprep.mubr.f32.mxu1 %v4317_v6 }
 0x336   : > { %2299 = vmatmul.mubr.msk.f32.gmra.mrb[6].mxu0 %vm1012_vm12, %v1896_v3 }
 0x337   : > { %2011 = vmatprep.mubr.f32.mxu0 %v4317_v6 }
 0x338   : > { %2303 = vmatmul.mubr.msk.f32.gmra.mrb[6].mxu1 %vm1012_vm12, %v1896_v3 }
 0x339   : > { %2100 = vmatprep.mubr.f32.mxu1 %v4317_v6 }
 0x33a   : > { %2300 = vmatmul.mubr.msk.f32.gmra.mrb[8].mxu0 %vm1012_vm12, %v1897_v12 }
 0x33b   : > { %2017 = vmatprep.mubr.f32.mxu0 %v4317_v6 }
 0x33c   : > { %2304 = vmatmul.mubr.msk.f32.gmra.mrb[8].mxu1 %vm1012_vm12, %v1897_v12 }
 0x33d   : > { %2106 = vmatprep.mubr.f32.mxu1 %v4317_v6  ;;  %v2523_v6 = vld [vmem:[%s2874_s29 + $0x40] sm:$0xff] }
 0x33e   : > { %2301 = vmatmul.mubr.msk.f32.gmra.mrb[10].mxu0 %vm1012_vm12, %v1898_v43 }
 0x340   : > { %2305 = vmatmul.mubr.msk.f32.gmra.mrb[10].mxu1 %vm1012_vm12, %v1898_v43 }
 0x405   : > { %v2001_v25 = vpop.f32.mrb[4].mxu0 }
 0x406   : > { %v2002_v11 = vadd.f32 %v2001_v25, %v1906_v18  ;;  %v2003_v5 = vpop.f32.mrb[5].mxu0 }
 0x407   : > { %v2004_v32 = vadd.f32 %v2003_v5, %v1906_v18  ;;  %v2090_v2 = vpop.f32.mrb[4].mxu1 }
 0x408   : > { %v2113_v48 = vadd.f32 %v2515_v35, %v2002_v11  ;;  %v2091_v16 = vadd.f32 %v2090_v2, %v1906_v18  ;;  %v2092_v49 = vpop.f32.mrb[5].mxu1  ;;  %v2527_v11 = vld [vmem:[%s2874_s29 + $0x60] sm:$0xff] }
 0x409   : > { %v2114_v55 = vadd.f32 %v2516_v58, %v2004_v32  ;;  %v2007_v34 = vpop.f32.mrb[6].mxu0  ;;  %v2093_v31 = vadd.f32 %v2092_v49, %v1906_v18  ;;  %v2526_v18 = vld [vmem:[%s2874_s29 + $0x58] sm:$0xff] }
 0x40a   : > { %v2129_v42 = vmax.f32 %v2113_v48, 0.0  ;;  %v2008_v52 = vadd.f32 %v2007_v34, %v1911_v46  ;;  %v2009_v59 = vpop.f32.mrb[7].mxu0  ;;  %v2115_v27 = vadd.f32 %v2517_v45, %v2091_v16  ;;  %v2528_v48 = vld [vmem:[%s2874_s29 + $0x68] sm:$0xff]  ;;  %v2529_v34 = vld [vmem:[%s2874_s29 + $0x70] sm:$0xff] }
 0x40b   : > { %v2130_v30 = vmax.f32 %v2114_v55, 0.0  ;;  %v2010_v62 = vadd.f32 %v2009_v59, %v1911_v46  ;;  %v2116_v15 = vadd.f32 %v2518_v50, %v2093_v31  ;;  %v2096_v54 = vpop.f32.mrb[6].mxu1 }
 0x40c   : > { %2145 = vst [vmem:[%s4006_s11] sm:$0xff] %v2129_v42  ;;  %v2117_v41 = vadd.f32 %v2519_v38, %v2008_v52  ;;  %v2131_v8 = vmax.f32 %v2115_v27, 0.0  ;;  %v2097_v36 = vadd.f32 %v2096_v54, %v1911_v46  ;;  %v2098_v53 = vpop.f32.mrb[7].mxu1  ;;  %v2530_v52 = vld [vmem:[%s2874_s29 + $0x78] sm:$0xff]  ;;  %s2684_s29 = smov [#allocation8]  }
 0x40d   : > { %2146 = vst [vmem:[%s4006_s11 + $0x8] sm:$0xff] %v2130_v30  ;;  %v2118_v7 = vadd.f32 %v2520_v29, %v2010_v62  ;;  %v2013_v24 = vpop.f32.mrb[8].mxu0  ;;  %v2132_v13 = vmax.f32 %v2116_v15, 0.0  ;;  %v2099_v63 = vadd.f32 %v2098_v53, %v1911_v46  ;;  %s2593_s20 = sshll.u32 %s2684_s29, 4  ;;  %s2594_s20 = int_to_ptr.vmem [resolvable:$false] %s2593_s20 }
 0x40e   : > { %v2133_v0 = vmax.f32 %v2117_v41, 0.0  ;;  %v2014_v23 = vadd.f32 %v2013_v24, %v1916_v1  ;;  %v2015_v33 = vpop.f32.mrb[9].mxu0  ;;  %2147 = vst [vmem:[%s4006_s11 + $0x10] sm:$0xff] %v2131_v8  ;;  %v2119_v39 = vadd.f32 %v2521_v40, %v2097_v36  ;;  %s2595_s15 = scalar_lea.vmem %s2594_s20, 4096  ;;  %p2596_p5 = scmp.lt.s32.totalorder %s4042_s16, %s2594_s20 }
 0x40f   : > { %v2134_v10 = vmax.f32 %v2118_v7, 0.0  ;;  %v2016_v51 = vadd.f32 %v2015_v33, %v1916_v1  ;;  %2148 = vst [vmem:[%s4006_s11 + $0x18] sm:$0xff] %v2132_v13  ;;  %v2120_v17 = vadd.f32 %v2522_v56, %v2099_v63  ;;  %v2102_v21 = vpop.f32.mrb[8].mxu1  ;;  %p2597_p0 = scmp.lt.s32.totalorder %s2595_s15, %s2589_s13 }
 0x410   : > { %2149 = vst [vmem:[%s4006_s11 + $0x20] sm:$0xff] %v2133_v0  ;;  %v2121_v44 = vadd.f32 %v2523_v6, %v2014_v23  ;;  %v2135_v20 = vmax.f32 %v2119_v39, 0.0  ;;  %v2103_v47 = vadd.f32 %v2102_v21, %v1916_v1  ;;  %v2104_v28 = vpop.f32.mrb[9].mxu1 }
 0x411   : > { %2150 = vst [vmem:[%s4006_s11 + $0x28] sm:$0xff] %v2134_v10  ;;  %v2122_v26 = vadd.f32 %v2524_v61, %v2016_v51  ;;  %v2019_v60 = vpop.f32.mrb[10].mxu0  ;;  %v2136_v4 = vmax.f32 %v2120_v17, 0.0  ;;  %v2105_v14 = vadd.f32 %v2104_v28, %v1916_v1  ;;  %p2598_p6 = por %p2597_p0, %p2596_p5 }
 0x412   : > { %v2137_v37 = vmax.f32 %v2121_v44, 0.0  ;;  %v2020_v19 = vadd.f32 %v2019_v60, %v1921_v9  ;;  %v2021_v57 = vpop.f32.mrb[11].mxu0  ;;  %2151 = vst [vmem:[%s4006_s11 + $0x30] sm:$0xff] %v2135_v20  ;;  %v2123_v3 = vadd.f32 %v2525_v22, %v2103_v47 }
 0x413   : > { %v2138_v12 = vmax.f32 %v2122_v26, 0.0  ;;  %v2022_v43 = vadd.f32 %v2021_v57, %v1921_v9  ;;  %2152 = vst [vmem:[%s4006_s11 + $0x38] sm:$0xff] %v2136_v4  ;;  %v2124_v25 = vadd.f32 %v2526_v18, %v2105_v14  ;;  %v2108_v32 = vpop.f32.mrb[10].mxu1  ;;  %p2599_p13 = pnand %p2598_p6, %p2592_p4 }
 0x414   : > { %2153 = vst [vmem:[%s4006_s11 + $0x40] sm:$0xff] %v2137_v37  ;;  %v2125_v5 = vadd.f32 %v2527_v11, %v2020_v19  ;;  %v2139_v46 = vmax.f32 %v2123_v3, 0.0  ;;  %v2109_v35 = vadd.f32 %v2108_v32, %v1921_v9  ;;  %v2110_v16 = vpop.f32.mrb[11].mxu1 }
 0x415   : > { %2154 = vst [vmem:[%s4006_s11 + $0x48] sm:$0xff] %v2138_v12  ;;  %v2126_v2 = vadd.f32 %v2528_v48, %v2022_v43  ;;  %v2140_v58 = vmax.f32 %v2124_v25, 0.0  ;;  %v2111_v49 = vadd.f32 %v2110_v16, %v1921_v9 }
 0x416   : > { %v2141_v55 = vmax.f32 %v2125_v5, 0.0  ;;  %2155 = vst [vmem:[%s4006_s11 + $0x50] sm:$0xff] %v2139_v46  ;;  %v2127_v42 = vadd.f32 %v2529_v34, %v2109_v35 }
 0x417   : > { %v2142_v31 = vmax.f32 %v2126_v2, 0.0  ;;  %2156 = vst [vmem:[%s4006_s11 + $0x58] sm:$0xff] %v2140_v58  ;;  %v2128_v59 = vadd.f32 %v2530_v52, %v2111_v49 }
 0x418   : > { %2157 = vst [vmem:[%s4006_s11 + $0x60] sm:$0xff] %v2141_v55  ;;  %v2143_v45 = vmax.f32 %v2127_v42, 0.0 }
 0x419   : > { %2158 = vst [vmem:[%s4006_s11 + $0x68] sm:$0xff] %v2142_v31  ;;  %v2144_v27 = vmax.f32 %v2128_v59, 0.0 }
 0x41a   : > { %2159 = vst [vmem:[%s4006_s11 + $0x70] sm:$0xff] %v2143_v45 }
 0x41b   : > { %2160 = vst [vmem:[%s4006_s11 + $0x78] sm:$0xff] %v2144_v27 }
 0x41c   : > { %2602 = shalt.err (!%p2599_p13)
}
 0x41d   : > { %s2603_s10 = scalar_lea.hbm %s4040_s23, 2048  ;;  %s2607_s14 = scalar_lea.hbm %s4096_s8, 4096 }
 0x41e   : > { %p2604_p7 = scmp.ne.s32.totalorder %s4040_s23, %s2603_s10  ;;  %p2608_p1 = scmp.lt.u32.totalorder %s4040_s23, %s4096_s8 }
 0x41f   : > { %p2609_p11 = scmp.lt.u32.totalorder %s2607_s14, %s2603_s10  ;;  %p2611_p9 = scmp.lt.u32.totalorder %s2603_s10, %s4040_s23 }
 0x420   : > { %p2605_p3 = pnand %p2604_p7, %p4318_p10 }
 0x421   : > { %p2610_p8 = por %p2609_p11, %p2608_p1 }
 0x422   : > { %p2606_p12 = pneg %p2605_p3 }
 0x423   : > { %p2612_p2 = por %p2611_p9, %p2610_p8 }
 0x425   : > { %p2613_p4 = pnand %p2612_p2, %p2606_p12 }
 0x427   : > { %2616 = shalt.err (!%p2613_p4)
}
 0x428   : > { %s2685_s26 = smov 512   ;;  %s2686_s19 = smov 32  }
 0x429   : > { %2439 = dma.vmem_to_hbm [thread:$0]  (%p4318_p10), %s4042_s16, 2048, %s4040_s23, %s2162_s9, %s2685_s26, %s2685_s26, %s2686_s19  }
 0x42a PF: > { %s2190_s24 = sand.u32 1, %s2647_s27   ;;  %p4319_p5 = scmp.ne.s32.totalorder %s4159_s18, 0 }
 0x42b   : > { %p4320_p0 = scmp.ge.s32.totalorder %s2659_s30, 2  ;;  %s2191_s13 = scalar_lea.sflag [#allocation5], %s2190_s24 }
 0x42d   : > { %p2450_p6 = pnand %p4320_p0, %p4319_p5 }
 0x42f   : > { %2642 = dma.done.wait (!%p2450_p6), %s2191_s13, 2048  }
 0x430   : > { %2644 = vsyncadd (!%p2450_p6), %s2191_s13, 4294965248  ;;  %s4321_s30 = sld [smem:[#allocation13_spill]]  ;;  %s4322_s29 = sld [smem:[#allocation12_spill]] }
 0x431   : > { %s4323_s20 = sld [smem:[#allocation14_spill]]  ;;  %s4324_s27 = smov %s2651_s28 }
 0x436   : > { %p22_p13 = scmp.ge.s32.totalorder %s4321_s30, 4   ;;  %s4325_s28 = smov %s4322_s29 }
 0x437   : > { %s4326_s29 = smov %s4323_s20 }
 0x438   :  { %24 = sbr.rel (!%p22_p13) target bundleno = 6 (0x6), region = 126 }
 0x43f   :  { %2196 = vsyncpa [#allocation4], 1 }
 0x440   :  { %2198 = vsyncpa [#allocation4 + $0x1], 1 }
 0x441   :  { %2199 = vsyncpa [#allocation7], 1 }
 0x442   :  { %2200 = vsyncpa [#allocation5], 1 }
 0x443   :  { %2202 = vsyncpa [#allocation5 + $0x1], 1 }

</bundles_post_ra>
